<compile_context>
chip_gen: v6e
topology: v6e:2x2x1
jax: 0.10.0
libtpu: 0.0.40
codegen_flags: <defaults>
</compile_context>

<pallas_src>
import math

import jax
import jax.numpy as jnp
import numpy as np
from jax.experimental import pallas as pl
from jax.experimental.pallas import tpu as pltpu

_REFRESH = 3  # exact jnp.sin/cos every 3rd octave; double-angle in between.


def _round_up(x, m):
    return (x + m - 1) // m * m


def _num_frequencies(in_features, sidelength=None, fn_samples=None, use_nyquist=True):
    """Mirror of PosEncodingNeRF.__init__ frequency selection."""
    def nyquist(samples):
        nyquist_rate = 1 / (2 * (2 * 1 / samples))
        return int(math.floor(math.log(nyquist_rate, 2)))

    if in_features == 3:
        return 10
    if in_features == 2:
        assert sidelength is not None
        if isinstance(sidelength, int):
            sidelength = (sidelength, sidelength)
        return nyquist(min(sidelength[0], sidelength[1])) if use_nyquist else 4
    if in_features == 1:
        assert fn_samples is not None
        return nyquist(fn_samples) if use_nyquist else 4
    raise ValueError("in_features must be 1, 2 or 3")


def _multi_tensorcore_chip():
    """True on chips with >1 TensorCore sharing a grid (v7x)."""
    try:
        kind = jax.devices()[0].device_kind.lower()
    except Exception:
        return False
    return "v7" in kind


def _make_kernel(in_features, num_frequencies):
    F = in_features
    # Hoisted constants: one f32 scale per frequency (2^i * pi), matching
    # torch's float32 angle computation.
    scales = tuple(np.float32((2.0 ** i) * np.pi) for i in range(num_frequencies))

    def kernel(x_ref, o_ref):
        x = x_ref[...]                                  # (F, tile) f32, lane-dense
        tile = x.shape[1]
        o_ref[0:F, :] = x.astype(o_ref.dtype)           # coordinate pass-through
        s = c = None
        for i in range(num_frequencies):
            if i % _REFRESH == 0:
                arg = scales[i] * x                     # exact f32 angle (matches torch)
                s = jnp.sin(arg)
                c = jnp.cos(arg)
            else:
                # Double-angle recurrence; 2^k scaling of the angle is exact in
                # f32, so this targets the same angles as the direct compute.
                s, c = 2.0 * (s * c), c * c - s * s
            # Interleave per-feature sin/cos rows -> PyTorch column order,
            # then one contiguous 2F-row store per frequency (no 3-row slices).
            blk = jnp.stack([s, c], axis=1).reshape(2 * F, tile)
            base = F + 2 * i * F
            o_ref[base:base + 2 * F, :] = blk.astype(o_ref.dtype)

    return kernel


def _pick_tile(rows, target, min_steps):
    """Lane-tile (multiple of 128); optionally force >= min_steps grid steps."""
    padded = _round_up(rows, 128)
    tile = max(128, min(target, padded) // 128 * 128)
    while min_steps > 1 and padded // tile < min_steps and tile > 128:
        tile = max(128, (tile // 2) // 128 * 128)
    return tile


def pos_encoding_nerf(coords, in_features, sidelength=None, fn_samples=None,
                      use_nyquist=True, out_dtype=jnp.float32,
                      tile_target=16384, feature_major=False):
    """JAX/Pallas equivalent of PosEncodingNeRF.forward -> (B, N, out_dim).

    out_dtype=jnp.bfloat16 halves the HBM-write-bound output stream (opt-in).
    feature_major=True returns the (out_dim, B*N) slab straight from the
    kernel (already in PyTorch column order along dim 0) so a consumer MLP can
    fold the transpose into its first matmul and skip the wrapper transpose.
    """
    nf = _num_frequencies(in_features, sidelength, fn_samples, use_nyquist)
    out_dim = in_features + 2 * in_features * nf

    B = coords.shape[0]
    coords = coords.reshape(B, -1, in_features)          # view(B, -1, in_features)
    N = coords.shape[1]
    rows = B * N

    multi_tc = _multi_tensorcore_chip()

    # Rows on the 128-lane axis: (in_features, rows), padded to a tile multiple.
    x_t = jnp.transpose(coords.reshape(rows, in_features).astype(jnp.float32))
    tile = _pick_tile(rows, tile_target, min_steps=2 if multi_tc else 1)
    rows_p = _round_up(rows, tile)
    steps = rows_p // tile
    if multi_tc and steps > 1 and steps % 2 == 1:        # even split across 2 TCs
        rows_p += tile
        steps += 1
    if rows_p != rows:
        x_t = jnp.pad(x_t, ((0, 0), (0, rows_p - rows)))

    use_core_parallel = multi_tc and steps >= 2
    sem = pltpu.CORE_PARALLEL if use_core_parallel else pltpu.PARALLEL

    kernel = _make_kernel(in_features, nf)
    n_exact = len(range(0, nf, _REFRESH))
    cost = pl.CostEstimate(
        flops=rows_p * in_features * nf * 8,              # scale + recurrence + interleave
        transcendentals=2 * rows_p * in_features * n_exact,
        bytes_accessed=rows_p * in_features * 4
        + rows_p * out_dim * jnp.dtype(out_dtype).itemsize,
    )

    out_t = pl.pallas_call(
        kernel,
        out_shape=jax.ShapeDtypeStruct((out_dim, rows_p), out_dtype),
        grid=(steps,),
        in_specs=[pl.BlockSpec((in_features, tile), lambda r: (0, r))],
        out_specs=pl.BlockSpec((out_dim, tile), lambda r: (0, r)),
        compiler_params=pltpu.CompilerParams(
            dimension_semantics=(sem,),
            vmem_limit_bytes=32 * 1024 * 1024),
        cost_estimate=cost,
    )(x_t)

    if feature_major:
        return out_t[:, :rows]                            # (out_dim, B*N), interleaved rows

    # Rows already in PyTorch order -> only a plain transpose remains.
    out = jnp.transpose(out_t[:, :rows])                  # (rows, out_dim)
    return out.reshape(B, N, out_dim)


def _reference(coords, in_features, num_frequencies):
    """Pure-numpy mirror of the PyTorch loop (float32 angles, like torch)."""
    B = coords.shape[0]
    c = np.asarray(coords, dtype=np.float32).reshape(B, -1, in_features)
    parts = [c.astype(np.float64)]
    for i in range(num_frequencies):
        for j in range(in_features):
            arg = (np.float32((2.0 ** i) * np.pi) * c[..., j]).astype(np.float64)
            parts.append(np.sin(arg)[..., None])
            parts.append(np.cos(arg)[..., None])
    out_dim = in_features + 2 * in_features * num_frequencies
    return np.concatenate(parts, axis=-1).reshape(B, -1, out_dim)


if __name__ == "__main__":
    k3, k2, k3b = jax.random.split(jax.random.PRNGKey(0), 3)

    # 3-D coords (NeRF default: 10 frequencies, out_dim = 63)
    coords3 = jax.random.uniform(k3, (2, 256, 3), dtype=jnp.float32,
                                 minval=-1.0, maxval=1.0)
    enc3 = jax.jit(lambda c: pos_encoding_nerf(c, 3))
    out3 = jax.block_until_ready(enc3(coords3))
    ref3 = _reference(np.asarray(coords3), 3, _num_frequencies(3))
    assert out3.shape == ref3.shape, (out3.shape, ref3.shape)
    np.testing.assert_allclose(np.asarray(out3), ref3, atol=2e-5, rtol=2e-5)

    # 2-D coords with a sidelength (Nyquist frequency count -> out_dim = 10)
    coords2 = jax.random.uniform(k2, (2, 256, 2), dtype=jnp.float32,
                                 minval=-1.0, maxval=1.0)
    enc2 = jax.jit(lambda c: pos_encoding_nerf(c, 2, sidelength=16))
    out2 = jax.block_until_ready(enc2(coords2))
    ref2 = _reference(np.asarray(coords2), 2, _num_frequencies(2, sidelength=16))
    assert out2.shape == ref2.shape, (out2.shape, ref2.shape)
    np.testing.assert_allclose(np.asarray(out2), ref2, atol=2e-5, rtol=2e-5)

    # 3-D coords, non-128-multiple rows + multi-step grid (exercise padding/tiling).
    coords3b = jax.random.uniform(k3b, (3, 300, 3), dtype=jnp.float32,
                                  minval=-1.0, maxval=1.0)
    enc3b = jax.jit(lambda c: pos_encoding_nerf(c, 3, tile_target=128))
    out3b = jax.block_until_ready(enc3b(coords3b))
    ref3b = _reference(np.asarray(coords3b), 3, _num_frequencies(3))
    assert out3b.shape == ref3b.shape, (out3b.shape, ref3b.shape)
    np.testing.assert_allclose(np.asarray(out3b), ref3b, atol=2e-5, rtol=2e-5)

    print("KERNEL_OK")
</pallas_src>

<mosaic_0001>
module attributes {stable_mosaic.version = 11 : i64} {
  func.func @kernel(%arg0: i32, %arg1: memref<3x512xf32, #tpu.memory_space<vmem>>, %arg2: memref<63x512xf32, #tpu.memory_space<vmem>>) attributes {dimension_semantics = [#tpu.dimension_semantics<parallel>], iteration_bounds = array<i64: 1>, scalar_prefetch = 0 : i64, scratch_operands = 0 : i64, tpu.core_type = #tpu.core_type<tc>, window_params = [{transform_indices = @transform_0, window_bounds = array<i64: 3, 512>}, {transform_indices = @transform_1, window_bounds = array<i64: 63, 512>}]} {
    %c0 = arith.constant 0 : index
    %c0_0 = arith.constant 0 : index
    %0 = vector.load %arg1[%c0, %c0_0] : memref<3x512xf32, #tpu.memory_space<vmem>>, vector<3x512xf32>
    %c0_1 = arith.constant 0 : index
    %c0_2 = arith.constant 0 : index
    %1 = vector.load %arg2[%c0_1, %c0_2] : memref<63x512xf32, #tpu.memory_space<vmem>>, vector<3x512xf32>
    tpu.vector_store %arg2[%c0_1, %c0_2], %0 {strides = array<i32>} : memref<63x512xf32, #tpu.memory_space<vmem>>, vector<3x512xf32>,
    %cst = arith.constant 3.14159274 : f32
    %2 = vector.broadcast %cst : f32 to vector<3x512xf32>
    %3 = arith.mulf %2, %0 : vector<3x512xf32>
    %4 = math.sin %3 : vector<3x512xf32>
    %5 = math.cos %3 : vector<3x512xf32>
    %6 = vector.shape_cast %4 : vector<3x512xf32> to vector<3x1x512xf32>
    %7 = vector.shape_cast %5 : vector<3x512xf32> to vector<3x1x512xf32>
    %8 = tpu.concatenate %6, %7 in 1 : vector<3x1x512xf32>, vector<3x1x512xf32> -> vector<3x2x512xf32>
    %9 = vector.shape_cast %8 : vector<3x2x512xf32> to vector<6x512xf32>
    %c3 = arith.constant 3 : index
    %c0_3 = arith.constant 0 : index
    %10 = vector.load %arg2[%c3, %c0_3] : memref<63x512xf32, #tpu.memory_space<vmem>>, vector<6x512xf32>
    tpu.vector_store %arg2[%c3, %c0_3], %9 {strides = array<i32>} : memref<63x512xf32, #tpu.memory_space<vmem>>, vector<6x512xf32>,
    %11 = arith.mulf %4, %5 : vector<3x512xf32>
    %cst_4 = arith.constant 2.000000e+00 : f32
    %12 = vector.broadcast %cst_4 : f32 to vector<3x512xf32>
    %13 = arith.mulf %12, %11 : vector<3x512xf32>
    %14 = arith.mulf %5, %5 : vector<3x512xf32>
    %15 = arith.mulf %4, %4 : vector<3x512xf32>
    %16 = arith.subf %14, %15 : vector<3x512xf32>
    %17 = vector.shape_cast %13 : vector<3x512xf32> to vector<3x1x512xf32>
    %18 = vector.shape_cast %16 : vector<3x512xf32> to vector<3x1x512xf32>
    %19 = tpu.concatenate %17, %18 in 1 : vector<3x1x512xf32>, vector<3x1x512xf32> -> vector<3x2x512xf32>
    %20 = vector.shape_cast %19 : vector<3x2x512xf32> to vector<6x512xf32>
    %c9 = arith.constant 9 : index
    %c0_5 = arith.constant 0 : index
    %21 = vector.load %arg2[%c9, %c0_5] : memref<63x512xf32, #tpu.memory_space<vmem>>, vector<6x512xf32>
    tpu.vector_store %arg2[%c9, %c0_5], %20 {strides = array<i32>} : memref<63x512xf32, #tpu.memory_space<vmem>>, vector<6x512xf32>,
    %22 = arith.mulf %13, %16 : vector<3x512xf32>
    %cst_6 = arith.constant 2.000000e+00 : f32
    %23 = vector.broadcast %cst_6 : f32 to vector<3x512xf32>
    %24 = arith.mulf %23, %22 : vector<3x512xf32>
    %25 = arith.mulf %16, %16 : vector<3x512xf32>
    %26 = arith.mulf %13, %13 : vector<3x512xf32>
    %27 = arith.subf %25, %26 : vector<3x512xf32>
    %28 = vector.shape_cast %24 : vector<3x512xf32> to vector<3x1x512xf32>
    %29 = vector.shape_cast %27 : vector<3x512xf32> to vector<3x1x512xf32>
    %30 = tpu.concatenate %28, %29 in 1 : vector<3x1x512xf32>, vector<3x1x512xf32> -> vector<3x2x512xf32>
    %31 = vector.shape_cast %30 : vector<3x2x512xf32> to vector<6x512xf32>
    %c15 = arith.constant 15 : index
    %c0_7 = arith.constant 0 : index
    %32 = vector.load %arg2[%c15, %c0_7] : memref<63x512xf32, #tpu.memory_space<vmem>>, vector<6x512xf32>
    tpu.vector_store %arg2[%c15, %c0_7], %31 {strides = array<i32>} : memref<63x512xf32, #tpu.memory_space<vmem>>, vector<6x512xf32>,
    %cst_8 = arith.constant 25.1327419 : f32
    %33 = vector.broadcast %cst_8 : f32 to vector<3x512xf32>
    %34 = arith.mulf %33, %0 : vector<3x512xf32>
    %35 = math.sin %34 : vector<3x512xf32>
    %36 = math.cos %34 : vector<3x512xf32>
    %37 = vector.shape_cast %35 : vector<3x512xf32> to vector<3x1x512xf32>
    %38 = vector.shape_cast %36 : vector<3x512xf32> to vector<3x1x512xf32>
    %39 = tpu.concatenate %37, %38 in 1 : vector<3x1x512xf32>, vector<3x1x512xf32> -> vector<3x2x512xf32>
    %40 = vector.shape_cast %39 : vector<3x2x512xf32> to vector<6x512xf32>
    %c21 = arith.constant 21 : index
    %c0_9 = arith.constant 0 : index
    %41 = vector.load %arg2[%c21, %c0_9] : memref<63x512xf32, #tpu.memory_space<vmem>>, vector<6x512xf32>
    tpu.vector_store %arg2[%c21, %c0_9], %40 {strides = array<i32>} : memref<63x512xf32, #tpu.memory_space<vmem>>, vector<6x512xf32>,
    %42 = arith.mulf %35, %36 : vector<3x512xf32>
    %cst_10 = arith.constant 2.000000e+00 : f32
    %43 = vector.broadcast %cst_10 : f32 to vector<3x512xf32>
    %44 = arith.mulf %43, %42 : vector<3x512xf32>
    %45 = arith.mulf %36, %36 : vector<3x512xf32>
    %46 = arith.mulf %35, %35 : vector<3x512xf32>
    %47 = arith.subf %45, %46 : vector<3x512xf32>
    %48 = vector.shape_cast %44 : vector<3x512xf32> to vector<3x1x512xf32>
    %49 = vector.shape_cast %47 : vector<3x512xf32> to vector<3x1x512xf32>
    %50 = tpu.concatenate %48, %49 in 1 : vector<3x1x512xf32>, vector<3x1x512xf32> -> vector<3x2x512xf32>
    %51 = vector.shape_cast %50 : vector<3x2x512xf32> to vector<6x512xf32>
    %c27 = arith.constant 27 : index
    %c0_11 = arith.constant 0 : index
    %52 = vector.load %arg2[%c27, %c0_11] : memref<63x512xf32, #tpu.memory_space<vmem>>, vector<6x512xf32>
    tpu.vector_store %arg2[%c27, %c0_11], %51 {strides = array<i32>} : memref<63x512xf32, #tpu.memory_space<vmem>>, vector<6x512xf32>,
    %53 = arith.mulf %44, %47 : vector<3x512xf32>
    %cst_12 = arith.constant 2.000000e+00 : f32
    %54 = vector.broadcast %cst_12 : f32 to vector<3x512xf32>
    %55 = arith.mulf %54, %53 : vector<3x512xf32>
    %56 = arith.mulf %47, %47 : vector<3x512xf32>
    %57 = arith.mulf %44, %44 : vector<3x512xf32>
    %58 = arith.subf %56, %57 : vector<3x512xf32>
    %59 = vector.shape_cast %55 : vector<3x512xf32> to vector<3x1x512xf32>
    %60 = vector.shape_cast %58 : vector<3x512xf32> to vector<3x1x512xf32>
    %61 = tpu.concatenate %59, %60 in 1 : vector<3x1x512xf32>, vector<3x1x512xf32> -> vector<3x2x512xf32>
    %62 = vector.shape_cast %61 : vector<3x2x512xf32> to vector<6x512xf32>
    %c33 = arith.constant 33 : index
    %c0_13 = arith.constant 0 : index
    %63 = vector.load %arg2[%c33, %c0_13] : memref<63x512xf32, #tpu.memory_space<vmem>>, vector<6x512xf32>
    tpu.vector_store %arg2[%c33, %c0_13], %62 {strides = array<i32>} : memref<63x512xf32, #tpu.memory_space<vmem>>, vector<6x512xf32>,
    %cst_14 = arith.constant 201.061935 : f32
    %64 = vector.broadcast %cst_14 : f32 to vector<3x512xf32>
    %65 = arith.mulf %64, %0 : vector<3x512xf32>
    %66 = math.sin %65 : vector<3x512xf32>
    %67 = math.cos %65 : vector<3x512xf32>
    %68 = vector.shape_cast %66 : vector<3x512xf32> to vector<3x1x512xf32>
    %69 = vector.shape_cast %67 : vector<3x512xf32> to vector<3x1x512xf32>
    %70 = tpu.concatenate %68, %69 in 1 : vector<3x1x512xf32>, vector<3x1x512xf32> -> vector<3x2x512xf32>
    %71 = vector.shape_cast %70 : vector<3x2x512xf32> to vector<6x512xf32>
    %c39 = arith.constant 39 : index
    %c0_15 = arith.constant 0 : index
    %72 = vector.load %arg2[%c39, %c0_15] : memref<63x512xf32, #tpu.memory_space<vmem>>, vector<6x512xf32>
    tpu.vector_store %arg2[%c39, %c0_15], %71 {strides = array<i32>} : memref<63x512xf32, #tpu.memory_space<vmem>>, vector<6x512xf32>,
    %73 = arith.mulf %66, %67 : vector<3x512xf32>
    %cst_16 = arith.constant 2.000000e+00 : f32
    %74 = vector.broadcast %cst_16 : f32 to vector<3x512xf32>
    %75 = arith.mulf %74, %73 : vector<3x512xf32>
    %76 = arith.mulf %67, %67 : vector<3x512xf32>
    %77 = arith.mulf %66, %66 : vector<3x512xf32>
    %78 = arith.subf %76, %77 : vector<3x512xf32>
    %79 = vector.shape_cast %75 : vector<3x512xf32> to vector<3x1x512xf32>
    %80 = vector.shape_cast %78 : vector<3x512xf32> to vector<3x1x512xf32>
    %81 = tpu.concatenate %79, %80 in 1 : vector<3x1x512xf32>, vector<3x1x512xf32> -> vector<3x2x512xf32>
    %82 = vector.shape_cast %81 : vector<3x2x512xf32> to vector<6x512xf32>
    %c45 = arith.constant 45 : index
    %c0_17 = arith.constant 0 : index
    %83 = vector.load %arg2[%c45, %c0_17] : memref<63x512xf32, #tpu.memory_space<vmem>>, vector<6x512xf32>
    tpu.vector_store %arg2[%c45, %c0_17], %82 {strides = array<i32>} : memref<63x512xf32, #tpu.memory_space<vmem>>, vector<6x512xf32>,
    %84 = arith.mulf %75, %78 : vector<3x512xf32>
    %cst_18 = arith.constant 2.000000e+00 : f32
    %85 = vector.broadcast %cst_18 : f32 to vector<3x512xf32>
    %86 = arith.mulf %85, %84 : vector<3x512xf32>
    %87 = arith.mulf %78, %78 : vector<3x512xf32>
    %88 = arith.mulf %75, %75 : vector<3x512xf32>
    %89 = arith.subf %87, %88 : vector<3x512xf32>
    %90 = vector.shape_cast %86 : vector<3x512xf32> to vector<3x1x512xf32>
    %91 = vector.shape_cast %89 : vector<3x512xf32> to vector<3x1x512xf32>
    %92 = tpu.concatenate %90, %91 in 1 : vector<3x1x512xf32>, vector<3x1x512xf32> -> vector<3x2x512xf32>
    %93 = vector.shape_cast %92 : vector<3x2x512xf32> to vector<6x512xf32>
    %c51 = arith.constant 51 : index
    %c0_19 = arith.constant 0 : index
    %94 = vector.load %arg2[%c51, %c0_19] : memref<63x512xf32, #tpu.memory_space<vmem>>, vector<6x512xf32>
    tpu.vector_store %arg2[%c51, %c0_19], %93 {strides = array<i32>} : memref<63x512xf32, #tpu.memory_space<vmem>>, vector<6x512xf32>,
    %cst_20 = arith.constant 1608.49548 : f32
    %95 = vector.broadcast %cst_20 : f32 to vector<3x512xf32>
    %96 = arith.mulf %95, %0 : vector<3x512xf32>
    %97 = math.sin %96 : vector<3x512xf32>
    %98 = math.cos %96 : vector<3x512xf32>
    %99 = vector.shape_cast %97 : vector<3x512xf32> to vector<3x1x512xf32>
    %100 = vector.shape_cast %98 : vector<3x512xf32> to vector<3x1x512xf32>
    %101 = tpu.concatenate %99, %100 in 1 : vector<3x1x512xf32>, vector<3x1x512xf32> -> vector<3x2x512xf32>
    %102 = vector.shape_cast %101 : vector<3x2x512xf32> to vector<6x512xf32>
    %c57 = arith.constant 57 : index
    %c0_21 = arith.constant 0 : index
    %103 = vector.load %arg2[%c57, %c0_21] : memref<63x512xf32, #tpu.memory_space<vmem>>, vector<6x512xf32>
    tpu.vector_store %arg2[%c57, %c0_21], %102 {strides = array<i32>} : memref<63x512xf32, #tpu.memory_space<vmem>>, vector<6x512xf32>,
    return
  }
  func.func @transform_0(%arg0: i32) -> (i32, i32) {
    %c0_i32 = arith.constant 0 : i32
    %c0_i32_0 = arith.constant 0 : i32
    return %c0_i32, %arg0 : i32, i32
  }
  func.func @transform_1(%arg0: i32) -> (i32, i32) {
    %c0_i32 = arith.constant 0 : i32
    %c0_i32_0 = arith.constant 0 : i32
    return %c0_i32, %arg0 : i32, i32
  }
}

</mosaic_0001>

<bundles_post_ra>
// kernel: _lambda_.1
= control target key start
LH: loop header
LB: loop body
LE: loop exit
PB: predicated region body
PF: predicated region fallthrough
CT: control target
= control target key end

     0   :  { %v5025_v33 = vmov 683565275   ;;  %v5026_v35 = vmov 2475754826   ;;  %v5027_v37 = vmov 2131351028   ;;  %s6914_s0 = inlined_call_operand.vmem [shape: f32[3,512], index: 0, kind: input, shape index: {}]   ;;  %s6915_s1 = inlined_call_operand.vmem [shape: f32[63,512], index: 1, kind: output, shape index: {}]  }
   0x1   :  { %v5046_v0 = vld [vmem:[%s6914_s0] sm:$0x77]  ;;  %v5066_v5 = vld [vmem:[%s6914_s0 + $0x8] sm:$0x77]  ;;  %v5028_v39 = vmov 2102212464  }
   0x2   :  { %16 = vst [vmem:[%s6915_s1] sm:$0x7] %v5046_v0  ;;  %v5053_v1 = vmul.f32 3.1415927, %v5046_v0  ;;  %v5056_v2 = vmul.f32 25.132742, %v5046_v0  ;;  %v12_v3 = vcombine.high %v5046_v0, %v5046_v0 }
   0x3   :  { %v5061_v4 = vmul.f32 201.06194, %v5046_v0  ;;  %18 = vst [vmem:[%s6915_s1 + $0x10] sm:$0x7] %v5066_v5  ;;  %v5029_v41 = vmov 920167782  }
   0x4   :  { %v22_v6 = vand.u32 2147483647, %v5053_v1  ;;  %v25_v7 = vand.u32 2139095040, %v5053_v1  ;;  %17 = vst [vmem:[%s6915_s1 + $0x8] sm:$0x7] %v12_v3  ;;  %v1394_v9 = vand.u32 2139095040, %v5056_v2 }
   0x5   :  { %v1391_v8 = vand.u32 2147483647, %v5056_v2  ;;  %v2762_v14 = vand.u32 2139095040, %v5061_v4  ;;  %v2759_v27 = vand.u32 2147483647, %v5061_v4 }
   0x6   :  { %v26_v10 = vshrl.u32 %v25_v7, 23  ;;  %v29_v11 = vand.u32 8388607, %v22_v6  ;;  %v1395_v12 = vshrl.u32 %v1394_v9, 23  ;;  %v5030_v49 = vmov 1326507024  }
   0x7   :  { %v1398_v13 = vand.u32 8388607, %v1391_v8  ;;  %v2763_v17 = vshrl.u32 %v2762_v14, 23 }
   0x8   :  { %v4857_v15 = vadd.s32 4294967169, %v26_v10  ;;  %v4882_v16 = vadd.s32 4294967169, %v1395_v12  ;;  %v30_v19 = vor.u32 8388608, %v29_v11 }
   0x9   :  { %v1399_v20 = vor.u32 8388608, %v1398_v13  ;;  %v4907_v22 = vadd.s32 4294967169, %v2763_v17 }
   0xa   :  { %v32_v18 = vadd.s32 1, %v4857_v15  ;;  %v1401_v21 = vadd.s32 1, %v4882_v16  ;;  %v5085_v28 = vshll.u32 %v30_v19, 8 }
   0xb   :  { %v5087_v30 = vshll.u32 %v1399_v20, 8  ;;  %v5089_v31 = vadd.s32 1, %v4907_v22 }
   0xc   :  { %vm33_vm0 = vcmp.gt.s32.totalorder %v32_v18, 0  ;;  %vm1402_vm1 = vcmp.gt.s32.totalorder %v1401_v21, 0 }
   0xd   :  { %v34_v23 = vsel %vm33_vm0, %v32_v18, 0  ;;  %v1403_v26 = vsel %vm1402_vm1, %v1401_v21, 0  ;;  %vm2770_vm6 = vcmp.gt.s32.totalorder %v5089_v31, 0 }
   0xe   :  { %v35_v24 = vshrl.u32 %v34_v23, 5  ;;  %v36_v25 = vand.u32 31, %v34_v23  ;;  %v1405_v29 = vand.u32 31, %v1403_v26  ;;  %v5096_v43 = vshrl.u32 %v1403_v26, 5 }
  0x10   :  { %v37_v32 = vsub.s32 32, %v36_v25  ;;  %v39_v34 = vshll.u32 %v5025_v33, %v36_v25  ;;  %v42_v36 = vshll.u32 %v5026_v35, %v36_v25  ;;  %v45_v38 = vshll.u32 %v5027_v37, %v36_v25 }
  0x11   :  { %v48_v40 = vshll.u32 %v5028_v39, %v36_v25  ;;  %v51_v42 = vshll.u32 %v5029_v41, %v36_v25  ;;  %vm54_vm2 = vcmp.lt.s32.totalorder %v35_v24, 1  ;;  %vm55_vm3 = vcmp.lt.s32.totalorder %v35_v24, 2 }
  0x12   :  { %v38_v44 = vshrl.u32 %v5025_v33, %v37_v32  ;;  %v40_v45 = vshrl.u32 %v5026_v35, %v37_v32  ;;  %v43_v46 = vshrl.u32 %v5027_v37, %v37_v32  ;;  %v46_v47 = vshrl.u32 %v5028_v39, %v37_v32 }
  0x13   :  { %v49_v48 = vshrl.u32 %v5029_v41, %v37_v32  ;;  %v52_v50 = vshrl.u32 %v5030_v49, %v37_v32  ;;  %vm57_vm4 = vcmp.lt.s32.totalorder %v35_v24, 4  ;;  %v1406_v54 = vsub.s32 32, %v1405_v29 }
  0x14   :  { %v41_v51 = vor.u32 %v40_v45, %v39_v34  ;;  %v44_v52 = vor.u32 %v43_v46, %v42_v36  ;;  %v47_v53 = vor.u32 %v46_v47, %v45_v38  ;;  %vm56_vm5 = vcmp.lt.s32.totalorder %v35_v24, 3 }
  0x15   :  { %v50_v55 = vor.u32 %v49_v48, %v48_v40  ;;  %v53_v56 = vor.u32 %v52_v50, %v51_v42  ;;  %v1408_v57 = vshll.u32 %v5025_v33, %v1405_v29  ;;  %v1411_v7 = vshll.u32 %v5026_v35, %v1405_v29 }
  0x16   :  { %v58_v58 = vsel %vm54_vm2, %v38_v44, %v41_v51  ;;  %v59_v59 = vsel %vm57_vm4, %v47_v53, 2102212464  ;;  %v62_v60 = vsel %vm54_vm2, %v41_v51, %v44_v52  ;;  %v66_v61 = vsel %vm54_vm2, %v44_v52, %v47_v53 }
  0x17   :  { %v60_v62 = vsel %vm56_vm5, %v44_v52, %v59_v59  ;;  %v63_v63 = vsel %vm57_vm4, %v50_v55, 920167782  ;;  %v67_v3 = vsel %vm57_vm4, %v53_v56, 1326507024  ;;  %v1407_v11 = vshrl.u32 %v5025_v33, %v1406_v54 }
  0x18   :  { %v64_v9 = vsel %vm56_vm5, %v47_v53, %v63_v63  ;;  %v68_v10 = vsel %vm56_vm5, %v50_v55, %v67_v3  ;;  %v1409_v12 = vshrl.u32 %v5026_v35, %v1406_v54  ;;  %v61_v13 = vsel %vm55_vm3, %v58_v58, %v60_v62 }
  0x19   :  { %v65_v14 = vsel %vm55_vm3, %v62_v60, %v64_v9  ;;  %v69_v15 = vsel %vm55_vm3, %v66_v61, %v68_v10  ;;  %v1412_v16 = vshrl.u32 %v5027_v37, %v1406_v54  ;;  %v1414_v23 = vshll.u32 %v5027_v37, %v1405_v29 }
  0x1a   :  { %v5117_v17 = vmul.u32.u64.low %v5085_v28, %v69_v15  ;;  %v5118_v18 = vmul.u32.u64.high %v5085_v28, %v69_v15, %v5117_v17  ;;  %v5121_v19 = vmul.u32.u64.low %v5085_v28, %v65_v14  ;;  %v5122_v20 = vmul.u32.u64.high %v5085_v28, %v65_v14, %v5121_v19 }
  0x1b   :  { %v1410_v21 = vor.u32 %v1409_v12, %v1408_v57  ;;  %v1413_v22 = vor.u32 %v1412_v16, %v1411_v7  ;;  %v1415_v25 = vshrl.u32 %v5028_v39, %v1406_v54  ;;  %v1417_v24 = vshll.u32 %v5028_v39, %v1405_v29 }
  0x1c   :  { %v1418_v26 = vshrl.u32 %v5029_v41, %v1406_v54  ;;  %v1420_v32 = vshll.u32 %v5029_v41, %v1405_v29  ;;  %v1421_v34 = vshrl.u32 %v5030_v49, %v1406_v54  ;;  %v77_v36 = vmul.u32 %v5085_v28, %v61_v13 }
  0x1d   :  { %v1416_v38 = vor.u32 %v1415_v25, %v1414_v23  ;;  %vm1423_vm7 = vcmp.lt.s32.totalorder %v5096_v43, 1  ;;  %vm1424_vm8 = vcmp.lt.s32.totalorder %v5096_v43, 2  ;;  %vm79_vm9 = vc.u32 %v5118_v18, %v5121_v19 }
  0x1e   :  { %v80_v40 = vadd.s32 1, %v5122_v20  ;;  %v1419_v42 = vor.u32 %v1418_v26, %v1417_v24  ;;  %vm1425_vm10 = vcmp.lt.s32.totalorder %v5096_v43, 3  ;;  %v1422_v44 = vor.u32 %v1421_v34, %v1420_v32 }
  0x1f   :  { %vm1426_vm11 = vcmp.lt.s32.totalorder %v5096_v43, 4  ;;  %v1427_v29 = vsel %vm1423_vm7, %v1407_v11, %v1410_v21  ;;  %v1431_v45 = vsel %vm1423_vm7, %v1410_v21, %v1413_v22  ;;  %v1435_v48 = vsel %vm1423_vm7, %v1413_v22, %v1416_v38 }
  0x20   :  { %v81_v28 = vsel %vm79_vm9, %v80_v40, %v5122_v20  ;;  %v1428_v46 = vsel %vm1426_vm11, %v1416_v38, 2102212464  ;;  %v1432_v47 = vsel %vm1426_vm11, %v1419_v42, 920167782  ;;  %v1436_v53 = vsel %vm1426_vm11, %v1422_v44, 1326507024 }
  0x21   :  { %v82_v50 = vadd.s32 %v81_v28, %v77_v36  ;;  %v1429_v51 = vsel %vm1425_vm10, %v1413_v22, %v1428_v46  ;;  %v1433_v52 = vsel %vm1425_vm10, %v1416_v38, %v1432_v47  ;;  %v1437_v56 = vsel %vm1425_vm10, %v1419_v42, %v1436_v53 }
  0x22   :  { %v1430_v54 = vsel %vm1424_vm8, %v1427_v29, %v1429_v51  ;;  %v1434_v55 = vsel %vm1424_vm8, %v1431_v45, %v1433_v52  ;;  %v2771_v57 = vsel %vm2770_vm6, %v5089_v31, 0  ;;  %v1438_v59 = vsel %vm1424_vm8, %v1435_v48, %v1437_v56 }
  0x23   :  { %v83_v58 = vadd.s32 536870912, %v82_v50  ;;  %v5150_v60 = vmul.u32.u64.low %v5087_v30, %v1434_v55  ;;  %v5151_v61 = vmul.u32.u64.high %v5087_v30, %v1434_v55, %v5150_v60  ;;  %v2766_v7 = vand.u32 8388607, %v2759_v27 }
  0x24   :  { %v5155_v62 = vmul.u32.u64.low %v5087_v30, %v1438_v59  ;;  %v5156_v63 = vmul.u32.u64.high %v5087_v30, %v1438_v59, %v5155_v62  ;;  %v2773_v9 = vand.u32 31, %v2771_v57  ;;  %v1446_v31 = vmul.u32 %v5087_v30, %v1430_v54 }
  0x25   :  { %v5158_v3 = vshrl.u32 %v83_v58, 30  ;;  %v5164_v43 = vmul.f32 1608.4955, %v5046_v0  ;;  %v1449_v11 = vadd.s32 1, %v5151_v61  ;;  %v2772_v12 = vshrl.u32 %v2771_v57, 5 }
  0x26   :  { %v2774_v13 = vsub.s32 32, %v2773_v9  ;;  %vm1448_vm12 = vc.u32 %v5156_v63, %v5150_v60  ;;  %v2776_v14 = vshll.u32 %v5025_v33, %v2773_v9  ;;  %v2767_v17 = vor.u32 8388608, %v2766_v7 }
  0x27   :  { %6928 = vst [vmem:[#allocation2_spill] sm:$0xff] %v5164_v43  ;;  %v85_v10 = vshll.u32 %v5158_v3, 30  ;;  %v1450_v16 = vsel %vm1448_vm12, %v1449_v11, %v5151_v61  ;;  %v2779_v30 = vshll.u32 %v5026_v35, %v2773_v9  ;;  %v4134_v22 = vand.u32 2139095040, %v5164_v43 }
  0x28   :  { %v1451_v0 = vadd.s32 %v1450_v16, %v1446_v31  ;;  %v2777_v20 = vshrl.u32 %v5026_v35, %v2774_v13  ;;  %v2780_v21 = vshrl.u32 %v5027_v37, %v2774_v13  ;;  %v2782_v25 = vshll.u32 %v5027_v37, %v2773_v9 }
  0x29   :  { %v5171_v15 = vsub.s32 %v82_v50, %v85_v10  ;;  %vm2791_vm13 = vcmp.lt.s32.totalorder %v2772_v12, 1  ;;  %vm2794_vm14 = vcmp.lt.s32.totalorder %v2772_v12, 4  ;;  %v2775_v26 = vshrl.u32 %v5025_v33, %v2774_v13 }
  0x2a   :  { %v1452_v24 = vadd.s32 536870912, %v1451_v0  ;;  %v2778_v32 = vor.u32 %v2777_v20, %v2776_v14  ;;  %v2783_v34 = vshrl.u32 %v5028_v39, %v2774_v13  ;;  %v2781_v38 = vor.u32 %v2780_v21, %v2779_v30 }
  0x2b   :  { %v88_v23 = vsub.s32 0, %v5171_v15  ;;  %v2785_v40 = vshll.u32 %v5028_v39, %v2773_v9  ;;  %v2786_v42 = vshrl.u32 %v5029_v41, %v2774_v13  ;;  %v2788_v45 = vshll.u32 %v5029_v41, %v2773_v9 }
  0x2c   :  { %v5185_v44 = vshrl.u32 %v1452_v24, 30  ;;  %v2784_v29 = vor.u32 %v2783_v34, %v2782_v25  ;;  %v2789_v28 = vshrl.u32 %v5030_v49, %v2774_v13  ;;  %vm2793_vm15 = vcmp.lt.s32.totalorder %v2772_v12, 3 }
  0x2d   :  { %v4858_v36 = vmin.u32 %v88_v23, %v5171_v15  ;;  %v2787_v47 = vor.u32 %v2786_v42, %v2785_v40  ;;  %v2807_v48 = vshll.u32 %v2767_v17, 8  ;;  %v4135_v53 = vshrl.u32 %v4134_v22, 23 }
  0x2e   :  { %v1454_v50 = vshll.u32 %v5185_v44, 30  ;;  %v2790_v51 = vor.u32 %v2789_v28, %v2788_v45  ;;  %v2796_v52 = vsel %vm2794_vm14, %v2784_v29, 2102212464  ;;  %vm2792_vm0 = vcmp.lt.s32.totalorder %v2772_v12, 2 }
  0x2f   :  { %v90_v46 = vclz %v4858_v36  ;;  %v2799_v55 = vsel %vm2791_vm13, %v2778_v32, %v2781_v38  ;;  %v2800_v56 = vsel %vm2794_vm14, %v2787_v47, 920167782  ;;  %v78_v57 = vadd.s32 %v5121_v19, %v5118_v18 }
  0x30   :  { %v1455_v58 = vsub.s32 %v1451_v0, %v1454_v50  ;;  %v2795_v59 = vsel %vm2791_vm13, %v2775_v26, %v2778_v32  ;;  %v2801_v61 = vsel %vm2793_vm15, %v2784_v29, %v2800_v56  ;;  %v2797_v62 = vsel %vm2793_vm15, %v2781_v38, %v2796_v52 }
  0x31   :  { %v4859_v54 = vadd.s32 4294967294, %v90_v46  ;;  %v2803_v7 = vsel %vm2791_vm13, %v2781_v38, %v2784_v29  ;;  %v2804_v9 = vsel %vm2794_vm14, %v2790_v51, 1326507024  ;;  %v2802_v11 = vsel %vm2792_vm0, %v2799_v55, %v2801_v61 }
  0x32   :  { %v1457_v10 = vsub.s32 0, %v1455_v58  ;;  %v4932_v13 = vadd.s32 4294967169, %v4135_v53  ;;  %v2805_v16 = vsel %vm2793_vm15, %v2787_v47, %v2804_v9  ;;  %v2798_v30 = vsel %vm2792_vm0, %v2795_v59, %v2797_v62 }
  0x33   :  { %vm4860_vm1 = vcmp.lt.s32.totalorder %v4859_v54, 0  ;;  %v2806_v0 = vsel %vm2792_vm0, %v2803_v7, %v2805_v16  ;;  %v4131_v20 = vand.u32 2147483647, %v5164_v43  ;;  %v108_v38 = vsub.s32 4, %v5158_v3 }
  0x34   :  { %v93_v31 = vsel %vm4860_vm1, 0, %v4859_v54  ;;  %v4883_v17 = vmin.u32 %v1457_v10, %v1455_v58  ;;  %v5206_v23 = vmul.u32.u64.low %v2807_v48, %v2806_v0  ;;  %v5207_v25 = vmul.u32.u64.high %v2807_v48, %v2806_v0, %v5206_v23 }
  0x35   :  { %v94_v14 = vsub.s32 32, %v93_v31  ;;  %v95_v18 = vshll.u32 %v5171_v15, %v93_v31  ;;  %v98_v19 = vsub.s32 4294967266, %v93_v31  ;;  %v4141_v15 = vadd.s32 1, %v4932_v13 }
  0x36   :  { %v1459_v24 = vclz %v4883_v17  ;;  %v5209_v26 = vmul.u32.u64.low %v2807_v48, %v2802_v11  ;;  %v5210_v32 = vmul.u32.u64.high %v2807_v48, %v2802_v11, %v5209_v26  ;;  %vm24_vm2 = vcmp.lt.s32.totalorder %v5053_v1, 0 }
  0x37   :  { %v96_v21 = vshrl.u32 %v78_v57, %v94_v14  ;;  %v99_v22 = vadd.s32 127, %v98_v19  ;;  %v5217_v40 = vand.u32 8388607, %v4131_v20  ;;  %vm4142_vm3 = vcmp.gt.s32.totalorder %v4141_v15, 0 }
  0x38   :  { %v4884_v12 = vadd.s32 4294967294, %v1459_v24  ;;  %v2814_v45 = vmul.u32 %v2807_v48, %v2798_v30  ;;  %vm2816_vm4 = vc.u32 %v5207_v25, %v5209_v26  ;;  %v1447_v28 = vadd.s32 %v5150_v60, %v5156_v63 }
  0x39   :  { %v97_v34 = vor.u32 %v96_v21, %v95_v18  ;;  %v100_v36 = vshll.u32 %v99_v22, 23  ;;  %v2817_v46 = vadd.s32 1, %v5210_v32  ;;  %v4143_v47 = vsel %vm4142_vm3, %v4141_v15, 0 }
  0x3a   :  { %vm4885_vm5 = vcmp.lt.s32.totalorder %v4884_v12, 0  ;;  %v109_v51 = vsel %vm24_vm2, %v108_v38, %v5158_v3  ;;  %v4145_v53 = vand.u32 31, %v4143_v47  ;;  %vm5230_vm6 = vcmp.le.f32.partialorder %v22_v6, 0.7853982 }
  0x3b   :  { %v101_v42 = vor.u32 4788187, %v100_v36  ;;  %v104_v29 = vcvt.s32.f32 %v97_v34  ;;  %v1462_v52 = vsel %vm4885_vm5, 0, %v4884_v12  ;;  %v2818_v56 = vsel %vm2816_vm4, %v2817_v46, %v5210_v32 }
  0x3c   :  { %v1463_v54 = vsub.s32 32, %v1462_v52  ;;  %v1464_v55 = vshll.u32 %v1455_v58, %v1462_v52  ;;  %v1467_v48 = vsub.s32 4294967266, %v1462_v52  ;;  %v2819_v59 = vadd.s32 %v2818_v56, %v2814_v45 }
  0x3d   :  { %v102_v50 = vand.u32 2147483647, %v101_v42  ;;  %v4146_v61 = vsub.s32 32, %v4145_v53  ;;  %vm1393_vm7 = vcmp.lt.s32.totalorder %v5056_v2, 0  ;;  %v111_v58 = vsel %vm5230_vm6, 0, %v109_v51 }
  0x3e   :  { %v1465_v63 = vshrl.u32 %v1447_v28, %v1463_v54  ;;  %v1468_v3 = vadd.s32 127, %v1467_v48  ;;  %v2820_v7 = vadd.s32 536870912, %v2819_v59  ;;  %v4139_v9 = vor.u32 8388608, %v5217_v40 }
  0x3f   :  { %v105_v57 = vmul.f32 %v104_v29, %v102_v50  ;;  %v4148_v11 = vshll.u32 %v5025_v33, %v4145_v53  ;;  %v4151_v6 = vshll.u32 %v5026_v35, %v4145_v53  ;;  %v4149_v18 = vshrl.u32 %v5026_v35, %v4146_v61 }
  0x40   :  { %v1466_v31 = vor.u32 %v1465_v63, %v1464_v55  ;;  %v1469_v10 = vshll.u32 %v1468_v3, 23  ;;  %v2821_v14 = vshrl.u32 %v2820_v7, 30  ;;  %v4152_v19 = vshrl.u32 %v5027_v37, %v4146_v61 }
  0x41   :  { %v106_v62 = vxor.u32 2147483648, %v105_v57  ;;  %v4144_v30 = vshrl.u32 %v4143_v47, 5  ;;  %v4157_v0 = vshll.u32 %v5028_v39, %v4145_v53  ;;  %vm5252_vm8 = vcmp.le.f32.partialorder %v1391_v8, 0.7853982 }
  0x42   :  { %v1470_v17 = vor.u32 4788187, %v1469_v10  ;;  %v1477_v22 = vsub.s32 4, %v5185_v44  ;;  %v2822_v23 = vshll.u32 %v2821_v14, 30  ;;  %v4154_v24 = vshll.u32 %v5027_v37, %v4145_v53 }
  0x43   :  { %v107_v13 = vsel %vm24_vm2, %v106_v62, %v105_v57  ;;  %v4155_v32 = vshrl.u32 %v5028_v39, %v4146_v61  ;;  %v1473_v34 = vcvt.s32.f32 %v1466_v31  ;;  %vm2761_vm9 = vcmp.lt.s32.totalorder %v5061_v4, 0 }
  0x44   :  { %v5247_v16 = vsel %vm5230_vm6, %v5053_v1, %v107_v13  ;;  %v1471_v15 = vand.u32 2147483647, %v1470_v17  ;;  %v4158_v36 = vshrl.u32 %v5029_v41, %v4146_v61  ;;  %v4160_v38 = vshll.u32 %v5029_v41, %v4145_v53 }
  0x45   :  { %v5262_v12 = vsub.s32 %v2819_v59, %v2822_v23  ;;  %v4150_v8 = vor.u32 %v4149_v18, %v4148_v11  ;;  %v4153_v40 = vor.u32 %v4152_v19, %v4151_v6  ;;  %v4161_v42 = vshrl.u32 %v5030_v49, %v4146_v61 }
  0x46   :  { %v115_v29 = vadd.s32 3, %v111_v58  ;;  %v4147_v45 = vshrl.u32 %v5025_v33, %v4146_v61  ;;  %v4159_v28 = vor.u32 %v4158_v36, %v4157_v0  ;;  %vm4163_vm10 = vcmp.lt.s32.totalorder %v4144_v30, 1 }
  0x47   :  { %v1478_v46 = vsel %vm1393_vm7, %v1477_v22, %v5185_v44  ;;  %v2825_v47 = vsub.s32 0, %v5262_v12  ;;  %v2845_v50 = vsub.s32 4, %v2821_v14  ;;  %v4156_v51 = vor.u32 %v4155_v32, %v4154_v24 }
  0x48   :  { %v1474_v52 = vmul.f32 %v1473_v34, %v1471_v15  ;;  %v4162_v53 = vor.u32 %v4161_v42, %v4160_v38  ;;  %vm4165_vm11 = vcmp.lt.s32.totalorder %v4144_v30, 3  ;;  %vm4166_vm12 = vcmp.lt.s32.totalorder %v4144_v30, 4 }
  0x49   :  { %vm5272_vm13 = vcmp.le.f32.partialorder %v2759_v27, 0.7853982  ;;  %v4908_v55 = vmin.u32 %v2825_v47, %v5262_v12  ;;  %vm4164_vm14 = vcmp.lt.s32.totalorder %v4144_v30, 2  ;;  %v4168_v48 = vsel %vm4166_vm12, %v4156_v51, 2102212464 }
  0x4a   :  { %v4171_v44 = vsel %vm4163_vm10, %v4150_v8, %v4153_v40  ;;  %v4167_v56 = vsel %vm4163_vm10, %v4147_v45, %v4150_v8  ;;  %v4172_v57 = vsel %vm4166_vm12, %v4159_v28, 920167782  ;;  %v4179_v59 = vshll.u32 %v4139_v9, 8 }
  0x4b   :  { %v5282_v61 = vmul.f32 3.1415927, %v5066_v5  ;;  %v2827_v60 = vclz %v4908_v55  ;;  %v4169_v27 = vsel %vm4165_vm11, %v4153_v40, %v4168_v48  ;;  %v4173_v63 = vsel %vm4165_vm11, %v4156_v51, %v4172_v57 }
  0x4c   :  { %v4175_v3 = vsel %vm4163_vm10, %v4153_v40, %v4156_v51  ;;  %v5287_v62 = vand.u32 3, %v111_v58  ;;  %v1480_v7 = vsel %vm5252_vm8, 0, %v1478_v46  ;;  %v4174_v31 = vsel %vm4164_vm14, %v4171_v44, %v4173_v63 }
  0x4d   :  { %v4176_v10 = vsel %vm4166_vm12, %v4162_v53, 1326507024  ;;  %v1475_v9 = vxor.u32 2147483648, %v1474_v52  ;;  %v4909_v11 = vadd.s32 4294967294, %v2827_v60  ;;  %v2846_v6 = vsel %vm2761_vm9, %v2845_v50, %v2821_v14 }
  0x4e   :  { %v4177_v13 = vsel %vm4165_vm11, %v4159_v28, %v4176_v10  ;;  %v4170_v18 = vsel %vm4164_vm14, %v4167_v56, %v4169_v27  ;;  %v5298_v58 = vmul.u32.u64.low %v4179_v59, %v4174_v31  ;;  %v5299_v17 = vmul.u32.u64.high %v4179_v59, %v4174_v31, %v5298_v58 }
  0x4f   :  { %v4178_v19 = vsel %vm4164_vm14, %v4175_v3, %v4177_v13  ;;  %vm4910_vm15 = vcmp.lt.s32.totalorder %v4909_v11, 0  ;;  %v129_v23 = vand.u32 2139095040, %v5282_v61  ;;  %v2815_v24 = vadd.s32 %v5209_v26, %v5207_v25 }
  0x50   :  { %v5301_v0 = vmul.u32.u64.low %v4179_v59, %v4178_v19  ;;  %v5302_v22 = vmul.u32.u64.high %v4179_v59, %v4178_v19, %v5301_v0  ;;  %v2830_v32 = vsel %vm4910_vm15, 0, %v4909_v11  ;;  %v126_v14 = vand.u32 2147483647, %v5282_v61 }
  0x51   :  { %v5309_v15 = vmul.f32 25.132742, %v5066_v5  ;;  %v2831_v30 = vsub.s32 32, %v2830_v32  ;;  %v2835_v34 = vsub.s32 4294967266, %v2830_v32  ;;  %v4186_v36 = vmul.u32 %v4179_v59, %v4170_v18 }
  0x52   :  { %v130_v38 = vshrl.u32 %v129_v23, 23  ;;  %v5311_v8 = vand.u32 3, %v115_v29  ;;  %v1484_v40 = vadd.s32 3, %v1480_v7  ;;  %v2848_v42 = vsel %vm5272_vm13, 0, %v2846_v6 }
  0x53   :  { %v4189_v45 = vadd.s32 1, %v5299_v17  ;;  %v1476_v25 = vsel %vm1393_vm7, %v1475_v9, %v1474_v52  ;;  %v2832_v26 = vshll.u32 %v5262_v12, %v2830_v32  ;;  %v2836_v28 = vadd.s32 127, %v2835_v34 }
  0x54   :  { %vm4188_vm0 = vc.u32 %v5302_v22, %v5298_v58  ;;  %v2833_v46 = vshrl.u32 %v2815_v24, %v2831_v30  ;;  %v4861_v50 = vadd.s32 4294967169, %v130_v38  ;;  %v1498_v29 = vand.u32 2139095040, %v5309_v15 }
  0x55   :  { %v4190_v47 = vsel %vm4188_vm0, %v4189_v45, %v5299_v17  ;;  %v5322_v51 = vand.u32 3, %v1480_v7  ;;  %v2837_v53 = vshll.u32 %v2836_v28, 23  ;;  %v133_v48 = vand.u32 8388607, %v126_v14 }
  0x56   :  { %v4191_v55 = vadd.s32 %v4190_v47, %v4186_v36  ;;  %v5326_v44 = vand.u32 3, %v1484_v40  ;;  %v2852_v52 = vadd.s32 3, %v2848_v42  ;;  %v136_v12 = vadd.s32 1, %v4861_v50 }
  0x57   :  { %v5329_v56 = vmul.f32 201.06194, %v5066_v5  ;;  %4993 = vcosq.f32 %v5247_v16  ;;  %v1479_v57 = vsel %vm5252_vm8, %v5056_v2, %v1476_v25  ;;  %v1495_v60 = vand.u32 2147483647, %v5309_v15 }
  0x58   :  { %v4192_v59 = vadd.s32 536870912, %v4191_v55  ;;  %v2834_v27 = vor.u32 %v2833_v46, %v2832_v26  ;;  %v2838_v63 = vor.u32 4788187, %v2837_v53  ;;  %vm137_vm1 = vcmp.gt.s32.totalorder %v136_v12, 0 }
  0x59   :  { %v1499_v3 = vshrl.u32 %v1498_v29, 23  ;;  %4995 = vsinq.f32 %v5247_v16  ;;  %v134_v31 = vor.u32 8388608, %v133_v48  ;;  %v138_v10 = vsel %vm137_vm1, %v136_v12, 0 }
  0x5a   :  { %v5337_v7 = vshrl.u32 %v4192_v59, 30  ;;  %4997 = vcosq.f32 %v1479_v57  ;;  %v5339_v9 = vand.u32 3, %v2852_v52  ;;  %v5341_v11 = vand.u32 3, %v2848_v42 }
  0x5b   :  { %v140_v21 = vand.u32 31, %v138_v10  ;;  %4999 = vsinq.f32 %v1479_v57  ;;  %v5344_v6 = vadd.s32 %v5298_v58, %v5302_v22  ;;  %v5349_v18 = vand.u32 8388607, %v1495_v60 }
  0x5c   :  { %6935 = vst [vmem:[#allocation3_spill] sm:$0xff] %v5341_v11  ;;  %v4194_v13 = vshll.u32 %v5337_v7, 30  ;;  %v2839_v16 = vand.u32 2147483647, %v2838_v63  ;;  %v2841_v19 = vcvt.s32.f32 %v2834_v27  ;;  %v4886_v0 = vadd.s32 4294967169, %v1499_v3 }
  0x5d   :  { %v141_v17 = vsub.s32 32, %v140_v21  ;;  %v143_v24 = vshll.u32 %v5025_v33, %v140_v21  ;;  %v146_v32 = vshll.u32 %v5026_v35, %v140_v21  ;;  %v5355_v30 = vshll.u32 %v134_v31, 8 }
  0x5e   :  { %v5351_v23 = vsub.s32 %v4191_v55, %v4194_v13  ;;  %v149_v34 = vshll.u32 %v5027_v37, %v140_v21  ;;  %v6916_v36 = vand.u32 2147483647, %v5329_v56  ;;  %v139_v40 = vshrl.u32 %v138_v10, 5 }
  0x5f   :  { %v144_v58 = vshrl.u32 %v5026_v35, %v141_v17  ;;  %v147_v22 = vshrl.u32 %v5027_v37, %v141_v17  ;;  %v152_v42 = vshll.u32 %v5028_v39, %v140_v21  ;;  %v1503_v45 = vor.u32 8388608, %v5349_v18 }
  0x60   :  { %v4197_v38 = vsub.s32 0, %v5351_v23  ;;  %v5364_v25 = vmul.f32 %v2841_v19, %v2839_v16  ;;  %v142_v26 = vshrl.u32 %v5025_v33, %v141_v17  ;;  %v150_v28 = vshrl.u32 %v5028_v39, %v141_v17 }
  0x61   :  { %v1505_v46 = vadd.s32 1, %v4886_v0  ;;  %vm4133_vm2 = vcmp.lt.s32.totalorder %v5164_v43, 0  ;;  %v145_v50 = vor.u32 %v144_v58, %v143_v24  ;;  %v148_v29 = vor.u32 %v147_v22, %v146_v32 }
  0x62   :  { %v4933_v47 = vmin.u32 %v4197_v38, %v5351_v23  ;;  %v153_v53 = vshrl.u32 %v5029_v41, %v141_v17  ;;  %v4217_v55 = vsub.s32 4, %v5337_v7  ;;  %v151_v48 = vor.u32 %v150_v28, %v149_v34 }
  0x63   :  { %v155_v52 = vshll.u32 %v5029_v41, %v140_v21  ;;  %v156_v12 = vshrl.u32 %v5030_v49, %v141_v17  ;;  %vm158_vm3 = vcmp.lt.s32.totalorder %v139_v40, 1  ;;  %vm159_vm4 = vcmp.lt.s32.totalorder %v139_v40, 2 }
  0x64   :  { %v4199_v57 = vclz %v4933_v47  ;;  %v154_v59 = vor.u32 %v153_v53, %v152_v42  ;;  %v5374_v27 = vpop.eup %4993  ;;  %vm5378_vm5 = vcmp.le.f32.partialorder %v4131_v20, 0.7853982  ;;  %vm160_vm6 = vcmp.lt.s32.totalorder %v139_v40, 3 }
  0x65   :  { %v157_v3 = vor.u32 %v156_v12, %v155_v52  ;;  %vm161_vm7 = vcmp.lt.s32.totalorder %v139_v40, 4  ;;  %v162_v31 = vsel %vm158_vm3, %v142_v26, %v145_v50  ;;  %v166_v13 = vsel %vm158_vm3, %v145_v50, %v148_v29 }
  0x66   :  { %v4934_v10 = vadd.s32 4294967294, %v4199_v57  ;;  %v163_v21 = vsel %vm161_vm7, %v151_v48, 2102212464  ;;  %v167_v18 = vsel %vm161_vm7, %v154_v59, 920167782  ;;  %v5382_v16 = vpop.eup %4995  ;;  %v170_v0 = vsel %vm158_vm3, %v148_v29, %v151_v48 }
  0x67   :  { %v164_v19 = vsel %vm160_vm6, %v148_v29, %v163_v21  ;;  %v168_v17 = vsel %vm160_vm6, %v151_v48, %v167_v18  ;;  %v171_v24 = vsel %vm161_vm7, %v157_v3, 1326507024  ;;  %v5386_v20 = vpop.eup %4997  ;;  %v2843_v32 = vxor.u32 2147483648, %v5364_v25 }
  0x68   :  { %vm4935_vm8 = vcmp.lt.s32.totalorder %v4934_v10, 0  ;;  %v169_v58 = vsel %vm159_vm4, %v166_v13, %v168_v17  ;;  %v172_v22 = vsel %vm160_vm6, %v154_v59, %v171_v24  ;;  %v5391_v34 = vpop.eup %4999  ;;  %v165_v53 = vsel %vm159_vm4, %v162_v31, %v164_v19 }
  0x69   :  { %v4202_v38 = vsel %vm4935_vm8, 0, %v4934_v10  ;;  %v173_v42 = vsel %vm159_vm4, %v170_v0, %v172_v22  ;;  %v5395_v26 = vmul.u32.u64.low %v5355_v30, %v169_v58  ;;  %v5396_v28 = vmul.u32.u64.high %v5355_v30, %v169_v58, %v5395_v26 }
  0x6a   :  { %v4203_v47 = vsub.s32 32, %v4202_v38  ;;  %v4204_v50 = vshll.u32 %v5351_v23, %v4202_v38  ;;  %v4207_v29 = vsub.s32 4294967266, %v4202_v38  ;;  %v4218_v48 = vsel %vm4133_vm2, %v4217_v55, %v5337_v7 }
  0x6b   :  { %v5405_v52 = vmul.u32.u64.low %v5355_v30, %v173_v42  ;;  %v5406_v12 = vmul.u32.u64.high %v5355_v30, %v173_v42, %v5405_v52  ;;  %vm1506_vm10 = vcmp.gt.s32.totalorder %v1505_v46, 0  ;;  %v5409_v10 = vshll.u32 %v1503_v45, 8 }
  0x6c   :  { %v4205_v57 = vshrl.u32 %v5344_v6, %v4203_v47  ;;  %v4208_v59 = vadd.s32 127, %v4207_v29  ;;  %v1507_v3 = vsel %vm1506_vm10, %v1505_v46, 0  ;;  %v181_v23 = vmul.u32 %v5355_v30, %v165_v53 }
  0x6d   :  { %v184_v40 = vadd.s32 1, %v5396_v28  ;;  %v1509_v31 = vand.u32 31, %v1507_v3  ;;  %v2866_v21 = vand.u32 2139095040, %v5329_v56  ;;  %v4220_v55 = vsel %vm5378_vm5, 0, %v4218_v48 }
  0x6e   :  { %v4206_v13 = vor.u32 %v4205_v57, %v4204_v50  ;;  %v4209_v7 = vshll.u32 %v4208_v59, 23  ;;  %v5418_v18 = vand.u32 8388607, %v6916_v36  ;;  %v2844_v6 = vsel %vm2761_vm9, %v2843_v32, %v5364_v25 }
  0x6f   :  { %vm183_vm11 = vc.u32 %v5406_v12, %v5395_v26  ;;  %v1508_v30 = vshrl.u32 %v1507_v3, 5  ;;  %v1510_v45 = vsub.s32 32, %v1509_v31  ;;  %v1512_v0 = vshll.u32 %v5025_v33, %v1509_v31 }
  0x70   :  { %v4210_v46 = vor.u32 4788187, %v4209_v7  ;;  %v4213_v19 = vcvt.s32.f32 %v4206_v13  ;;  %v185_v17 = vsel %vm183_vm11, %v184_v40, %v5396_v28  ;;  %v1515_v22 = vshll.u32 %v5026_v35, %v1509_v31 }
  0x71   :  { %v186_v24 = vadd.s32 %v185_v17, %v181_v23  ;;  %v1513_v58 = vshrl.u32 %v5026_v35, %v1510_v45  ;;  %v1516_v38 = vshrl.u32 %v5027_v37, %v1510_v45  ;;  %v1518_v25 = vshll.u32 %v5027_v37, %v1509_v31 }
  0x72   :  { %v4211_v42 = vand.u32 2147483647, %v4210_v46  ;;  %v1519_v32 = vshrl.u32 %v5028_v39, %v1510_v45  ;;  %v1521_v47 = vshll.u32 %v5028_v39, %v1509_v31  ;;  %v4224_v50 = vadd.s32 3, %v4220_v55 }
  0x73   :  { %v187_v29 = vadd.s32 536870912, %v186_v24  ;;  %v1522_v28 = vshrl.u32 %v5029_v41, %v1510_v45  ;;  %v2867_v53 = vshrl.u32 %v2866_v21, 23  ;;  %vm128_vm9 = vcmp.lt.s32.totalorder %v5282_v61, 0 }
  0x74   :  { %v4214_v48 = vmul.f32 %v4213_v19, %v4211_v42  ;;  %v1514_v52 = vor.u32 %v1513_v58, %v1512_v0  ;;  %v1524_v57 = vshll.u32 %v5029_v41, %v1509_v31  ;;  %v1525_v59 = vshrl.u32 %v5030_v49, %v1510_v45 }
  0x75   :  { %v188_v3 = vshrl.u32 %v187_v29, 30  ;;  %v1517_v23 = vor.u32 %v1516_v38, %v1515_v22  ;;  %v1520_v40 = vor.u32 %v1519_v32, %v1518_v25  ;;  %v1523_v13 = vor.u32 %v1522_v28, %v1521_v47 }
  0x76   :  { %v4215_v7 = vxor.u32 2147483648, %v4214_v48  ;;  %v1511_v46 = vshrl.u32 %v5025_v33, %v1510_v45  ;;  %vm1527_vm12 = vcmp.lt.s32.totalorder %v1508_v30, 1  ;;  %vm1530_vm14 = vcmp.lt.s32.totalorder %v1508_v30, 4 }
  0x77   :  { %v2847_v21 = vsel %vm5272_vm13, %v5061_v4, %v2844_v6  ;;  %v189_v19 = vshll.u32 %v188_v3, 30  ;;  %vm1529_vm15 = vcmp.lt.s32.totalorder %v1508_v30, 3  ;;  %v1532_v17 = vsel %vm1530_vm14, %v1520_v40, 2102212464 }
  0x78   :  { %v1526_v31 = vor.u32 %v1525_v59, %v1524_v57  ;;  %vm1528_vm0 = vcmp.lt.s32.totalorder %v1508_v30, 2  ;;  %v1536_v0 = vsel %vm1530_vm14, %v1523_v13, 920167782  ;;  %v4911_v58 = vadd.s32 4294967169, %v2867_v53 }
  0x79   :  { %v4216_v22 = vsel %vm4133_vm2, %v4215_v7, %v4214_v48  ;;  %vm5447_vm1 = vcmp.le.f32.partialorder %v126_v14, 0.7853982  ;;  %v5451_v54 = vsub.s32 %v186_v24, %v189_v19  ;;  %v212_v6 = vsub.s32 4, %v188_v3 }
  0x7a   :  { %v1535_v38 = vsel %vm1527_vm12, %v1514_v52, %v1517_v23  ;;  %v5454_v42 = vand.u32 3, %v4220_v55  ;;  %v1531_v25 = vsel %vm1527_vm12, %v1511_v46, %v1514_v52  ;;  %v1533_v32 = vsel %vm1529_vm15, %v1517_v23, %v1532_v17 }
  0x7b   :  { %v1537_v47 = vsel %vm1529_vm15, %v1520_v40, %v1536_v0  ;;  %5001 = vcosq.f32 %v2847_v21  ;;  %v192_v29 = vsub.s32 0, %v5451_v54  ;;  %v1539_v14 = vsel %vm1527_vm12, %v1517_v23, %v1520_v40 }
  0x7c   :  { %6940 = vst [vmem:[#allocation4_spill] sm:$0xff] %v5454_v42  ;;  %v2871_v28 = vor.u32 8388608, %v5418_v18  ;;  %v4219_v24 = vsel %vm5378_vm5, %v5164_v43, %v4216_v22  ;;  %v1538_v55 = vsel %vm1528_vm0, %v1535_v38, %v1537_v47  ;;  %v1540_v53 = vsel %vm1530_vm14, %v1526_v31, 1326507024 }
  0x7d   :  { %v2873_v48 = vadd.s32 1, %v4911_v58  ;;  %v4862_v52 = vmin.u32 %v192_v29, %v5451_v54  ;;  %v213_v57 = vsel %vm128_vm9, %v212_v6, %v188_v3  ;;  %v1534_v59 = vsel %vm1528_vm0, %v1531_v25, %v1533_v32 }
  0x7e   :  { %v1541_v23 = vsel %vm1529_vm15, %v1523_v13, %v1540_v53  ;;  %v5474_v40 = vmul.u32.u64.low %v5409_v10, %v1538_v55  ;;  %v5475_v63 = vmul.u32.u64.high %v5409_v10, %v1538_v55, %v5474_v40  ;;  %5003 = vsinq.f32 %v2847_v21 }
  0x7f   :  { %v1542_v18 = vsel %vm1528_vm0, %v1539_v14, %v1541_v23  ;;  %vm2874_vm13 = vcmp.gt.s32.totalorder %v2873_v48, 0  ;;  %v194_v7 = vclz %v4862_v52  ;;  %v5482_v3 = vand.u32 3, %v4224_v50 }
  0x80   :  { %v5479_v46 = vmul.u32.u64.low %v5409_v10, %v1542_v18  ;;  %v5480_v19 = vmul.u32.u64.high %v5409_v10, %v1542_v18, %v5479_v46  ;;  %v2875_v17 = vsel %vm2874_vm13, %v2873_v48, 0  ;;  %v5484_v0 = vshll.u32 %v2871_v28, 8 }
  0x81   :  { %6941 = vst [vmem:[#allocation5_spill] sm:$0xff] %v5482_v3  ;;  %v2877_v31 = vand.u32 31, %v2875_v17  ;;  %v182_v30 = vadd.s32 %v5395_v26, %v5406_v12  ;;  %v4863_v13 = vadd.s32 4294967294, %v194_v7  ;;  %v1550_v58 = vmul.u32 %v5409_v10, %v1534_v59 }
  0x82   :  { %v13_v22 = vcombine.high %v5066_v5, %v5066_v5  ;;  %5005 = vcosq.f32 %v4219_v24  ;;  %v5493_v6 = vsel %vm5447_vm1, 0, %v213_v57  ;;  %v1553_v50 = vadd.s32 1, %v5475_v63 }
  0x83   :  { %v2878_v21 = vsub.s32 32, %v2877_v31  ;;  %vm4864_vm2 = vcmp.lt.s32.totalorder %v4863_v13, 0  ;;  %vm1552_vm3 = vc.u32 %v5480_v19, %v5474_v40  ;;  %v5498_v38 = vshrl.u32 %v2875_v17, 5 }
  0x84   :  { %v2880_v26 = vshll.u32 %v5025_v33, %v2877_v31  ;;  %19 = vst [vmem:[%s6915_s1 + $0x18] sm:$0x7] %v13_v22  ;;  %v197_v12 = vsel %vm4864_vm2, 0, %v4863_v13  ;;  %v1554_v10 = vsel %vm1552_vm3, %v1553_v50, %v5475_v63  ;;  %v2883_v32 = vshll.u32 %v5026_v35, %v2877_v31 }
  0x85   :  { %v2881_v25 = vshrl.u32 %v5026_v35, %v2878_v21  ;;  %v198_v47 = vsub.s32 32, %v197_v12  ;;  %v199_v29 = vshll.u32 %v5451_v54, %v197_v12  ;;  %v202_v14 = vsub.s32 4294967266, %v197_v12 }
  0x86   :  { %v1555_v28 = vadd.s32 %v1554_v10, %v1550_v58  ;;  %v2884_v55 = vshrl.u32 %v5027_v37, %v2878_v21  ;;  %v2886_v53 = vshll.u32 %v5027_v37, %v2877_v31  ;;  %v2887_v48 = vshrl.u32 %v5028_v39, %v2878_v21 }
  0x87   :  { %v2889_v52 = vshll.u32 %v5028_v39, %v2877_v31  ;;  %v200_v57 = vshrl.u32 %v182_v30, %v198_v47  ;;  %v203_v59 = vadd.s32 127, %v202_v14  ;;  %v2890_v18 = vshrl.u32 %v5029_v41, %v2878_v21 }
  0x88   :  { %v1556_v23 = vadd.s32 536870912, %v1555_v28  ;;  %v5513_v63 = vpop.eup %5001  ;;  %5007 = vsinq.f32 %v4219_v24  ;;  %v2879_v54 = vshrl.u32 %v5025_v33, %v2878_v21  ;;  %v2892_v7 = vshll.u32 %v5029_v41, %v2877_v31 }
  0x89   :  { %v2893_v46 = vshrl.u32 %v5030_v49, %v2878_v21  ;;  %v201_v17 = vor.u32 %v200_v57, %v199_v29  ;;  %v204_v13 = vshll.u32 %v203_v59, 23  ;;  %v2882_v22 = vor.u32 %v2881_v25, %v2880_v26 }
  0x8a   :  { %v1557_v58 = vshrl.u32 %v1556_v23, 30  ;;  %vm1497_vm4 = vcmp.lt.s32.totalorder %v5309_v15, 0  ;;  %v2885_v30 = vor.u32 %v2884_v55, %v2883_v32  ;;  %v2888_v50 = vor.u32 %v2887_v48, %v2886_v53 }
  0x8b   :  { %v2891_v12 = vor.u32 %v2890_v18, %v2889_v52  ;;  %v2894_v10 = vor.u32 %v2893_v46, %v2892_v7  ;;  %v205_v47 = vor.u32 4788187, %v204_v13  ;;  %v208_v14 = vcvt.s32.f32 %v201_v17  ;;  %v5526_v31 = vpop.eup %5003 }
  0x8c   :  { %v1558_v36 = vshll.u32 %v1557_v58, 30  ;;  %vm2895_vm5 = vcmp.lt.s32.totalorder %v5498_v38, 1  ;;  %vm2896_vm6 = vcmp.lt.s32.totalorder %v5498_v38, 2  ;;  %vm2897_vm7 = vcmp.lt.s32.totalorder %v5498_v38, 3 }
  0x8d   :  { %vm2898_vm8 = vcmp.lt.s32.totalorder %v5498_v38, 4  ;;  %v5524_v24 = vmul.f32 1608.4955, %v5066_v5  ;;  %v206_v21 = vand.u32 2147483647, %v205_v47  ;;  %v1581_v32 = vsub.s32 4, %v1557_v58 }
  0x8e   :  { %vm5530_vm10 = vcmp.le.f32.partialorder %v1495_v60, 0.7853982  ;;  %v5534_v25 = vsub.s32 %v1555_v28, %v1558_v36  ;;  %v2900_v29 = vsel %vm2898_vm8, %v2888_v50, 2102212464  ;;  %v2899_v55 = vsel %vm2895_vm5, %v2879_v54, %v2882_v22 }
  0x8f   :  { %v2903_v5 = vsel %vm2895_vm5, %v2882_v22, %v2885_v30  ;;  %v2904_v53 = vsel %vm2898_vm8, %v2891_v12, 920167782  ;;  %v2908_v48 = vsel %vm2898_vm8, %v2894_v10, 1326507024  ;;  %v5540_v52 = vpop.eup %5005  ;;  %v209_v57 = vmul.f32 %v208_v14, %v206_v21 }
  0x90   :  { %6944 = vst [vmem:[#allocation6_spill] sm:$0xff] %v5540_v52  ;;  %v1561_v60 = vsub.s32 0, %v5534_v25  ;;  %v2901_v59 = vsel %vm2897_vm7, %v2885_v30, %v2900_v29  ;;  %v2907_v36 = vsel %vm2895_vm5, %v2885_v30, %v2888_v50  ;;  %v219_v28 = vadd.s32 3, %v5493_v6 }
  0x91   :  { %v2905_v23 = vsel %vm2897_vm7, %v2888_v50, %v2904_v53  ;;  %v2909_v18 = vsel %vm2897_vm7, %v2891_v12, %v2908_v48  ;;  %v4238_v54 = vand.u32 2139095040, %v5524_v24  ;;  %v210_v7 = vxor.u32 2147483648, %v209_v57 }
  0x92   :  { %v5554_v46 = vand.u32 3, %v5493_v6  ;;  %v4887_v17 = vmin.u32 %v1561_v60, %v5534_v25  ;;  %v2906_v13 = vsel %vm2896_vm6, %v2903_v5, %v2905_v23  ;;  %v2902_v22 = vsel %vm2896_vm6, %v2899_v55, %v2901_v59 }
  0x93   :  { %v2910_v30 = vsel %vm2896_vm6, %v2907_v36, %v2909_v18  ;;  %v5564_v50 = vmul.u32.u64.low %v5484_v0, %v2906_v13  ;;  %v5565_v12 = vmul.u32.u64.high %v5484_v0, %v2906_v13, %v5564_v50  ;;  %v1582_v6 = vsel %vm1497_vm4, %v1581_v32, %v1557_v58 }
  0x94   :  { %v1563_v10 = vclz %v4887_v17  ;;  %v5571_v47 = vmul.u32.u64.low %v5484_v0, %v2910_v30  ;;  %v5572_v14 = vmul.u32.u64.high %v5484_v0, %v2910_v30, %v5571_v47  ;;  %v211_v21 = vsel %vm128_vm9, %v210_v7, %v209_v57 }
  0x95   :  { %v5576_v29 = vand.u32 3, %v219_v28  ;;  %v4239_v38 = vshrl.u32 %v4238_v54, 23  ;;  %vm118_vm11 = vcmp.eq.s32.totalorder %v5311_v8, 0  ;;  %v5579_v55 = vpop.eup %5007  ;;  %v2918_v53 = vmul.u32 %v5484_v0, %v2902_v22 }
  0x96   :  { %6945 = vst [vmem:[#allocation7_spill] sm:$0xff] %v5579_v55  ;;  %v4888_v5 = vadd.s32 4294967294, %v1563_v10  ;;  %v4235_v48 = vand.u32 2147483647, %v5524_v24  ;;  %v119_v58 = vxor.u32 2147483648, %v5382_v16  ;;  %v1551_v32 = vadd.s32 %v5474_v40, %v5480_v19 }
  0x97   :  { %v1584_v57 = vsel %vm5530_vm10, 0, %v1582_v6  ;;  %v2921_v60 = vadd.s32 1, %v5565_v12  ;;  %v4936_v59 = vadd.s32 4294967169, %v4239_v38  ;;  %v214_v36 = vsel %vm5447_vm1, %v5282_v61, %v211_v21 }
  0x98   :  { %vm4889_vm9 = vcmp.lt.s32.totalorder %v4888_v5, 0  ;;  %vm2920_vm12 = vc.u32 %v5572_v14, %v5564_v50  ;;  %v120_v0 = vsel %vm118_vm11, %v5374_v27, %v119_v58  ;;  %vm121_vm14 = vcmp.eq.s32.totalorder %v5311_v8, 2 }
  0x99   :  { %v1566_v28 = vsel %vm4889_vm9, 0, %v4888_v5  ;;  %v2922_v40 = vsel %vm2920_vm12, %v2921_v60, %v5565_v12  ;;  %v4245_v19 = vadd.s32 1, %v4936_v59  ;;  %v4242_v7 = vand.u32 8388607, %v4235_v48 }
  0x9a   :  { %v1567_v23 = vsub.s32 32, %v1566_v28  ;;  %v1568_v18 = vshll.u32 %v5534_v25, %v1566_v28  ;;  %v1571_v54 = vsub.s32 4294967266, %v1566_v28  ;;  %v2923_v45 = vadd.s32 %v2922_v40, %v2918_v53 }
  0x9b   :  { %vm4246_vm15 = vcmp.gt.s32.totalorder %v4245_v19, 0  ;;  %vm117_vm0 = vcmp.lt.s32.totalorder %v5311_v8, 2  ;;  %v122_v17 = vxor.u32 2147483648, %v5374_v27  ;;  %5009 = vsinq.f32 %v214_v36 }
  0x9c   :  { %v1569_v13 = vshrl.u32 %v1551_v32, %v1567_v23  ;;  %v1572_v22 = vadd.s32 127, %v1571_v54  ;;  %v2924_v30 = vadd.s32 536870912, %v2923_v45  ;;  %v4247_v12 = vsel %vm4246_vm15, %v4245_v19, 0 }
  0x9d   :  { %v1588_v10 = vadd.s32 3, %v1584_v57  ;;  %v4249_v6 = vand.u32 31, %v4247_v12  ;;  %v123_v25 = vsel %vm121_vm14, %v122_v17, %v5382_v16  ;;  %5011 = vcosq.f32 %v214_v36 }
  0x9e   :  { %v1570_v47 = vor.u32 %v1569_v13, %v1568_v18  ;;  %v1573_v21 = vshll.u32 %v1572_v22, 23  ;;  %v2925_v38 = vshrl.u32 %v2924_v30, 30  ;;  %v5609_v5 = vsel %vm117_vm0, %v120_v0, %v123_v25 }
  0x9f   :  { %v5611_v53 = vand.u32 3, %v1584_v57  ;;  %v4243_v32 = vor.u32 8388608, %v4242_v7  ;;  %v4250_v60 = vsub.s32 32, %v4249_v6  ;;  %vm2865_vm1 = vcmp.lt.s32.totalorder %v5329_v56, 0 }
  0xa0   :  { %v1574_v59 = vor.u32 4788187, %v1573_v21  ;;  %v2926_v28 = vshll.u32 %v2925_v38, 30  ;;  %v4248_v40 = vshrl.u32 %v4247_v12, 5  ;;  %v4252_v19 = vshll.u32 %v5025_v33, %v4249_v6 }
  0xa1   :  { %v4253_v8 = vshrl.u32 %v5026_v35, %v4250_v60  ;;  %v4255_v23 = vshll.u32 %v5026_v35, %v4249_v6  ;;  %v4256_v18 = vshrl.u32 %v5027_v37, %v4250_v60  ;;  %v4258_v0 = vshll.u32 %v5027_v37, %v4249_v6 }
  0xa2   :  { %vm114_vm13 = vweird.f32 %v5053_v1  ;;  %v1575_v57 = vand.u32 2147483647, %v1574_v59  ;;  %v1577_v36 = vcvt.s32.f32 %v1570_v47  ;;  %v5620_v54 = vsub.s32 %v2923_v45, %v2926_v28 }
  0xa3   :  { %v4259_v7 = vshrl.u32 %v5028_v39, %v4250_v60  ;;  %v5623_v13 = vand.u32 3, %v1588_v10  ;;  %v2919_v22 = vadd.s32 %v5564_v50, %v5572_v14  ;;  %v4261_v30 = vshll.u32 %v5028_v39, %v4249_v6 }
  0xa4   :  { %v5628_v35 = vshll.u32 %v4243_v32, 8  ;;  %v2929_v12 = vsub.s32 0, %v5620_v54  ;;  %v2949_v37 = vsub.s32 4, %v2925_v38  ;;  %v4251_v25 = vshrl.u32 %v5025_v33, %v4250_v60 }
  0xa5   :  { %v4254_v21 = vor.u32 %v4253_v8, %v4252_v19  ;;  %v4257_v47 = vor.u32 %v4256_v18, %v4255_v23  ;;  %v4262_v45 = vshrl.u32 %v5029_v41, %v4250_v60  ;;  %v4264_v59 = vshll.u32 %v5029_v41, %v4249_v6 }
  0xa6   :  { %v4265_v10 = vshrl.u32 %v5030_v49, %v4250_v60  ;;  %v1578_v28 = vmul.f32 %v1577_v36, %v1575_v57  ;;  %v6946_v50 = vand.u32 2147483647, %v5329_v56  ;;  %v4912_v14 = vmin.u32 %v2929_v12, %v5620_v54 }
  0xa7   :  { %v4260_v32 = vor.u32 %v4259_v7, %v4258_v0  ;;  %vm4267_vm3 = vcmp.lt.s32.totalorder %v4248_v40, 1  ;;  %v4263_v33 = vor.u32 %v4262_v45, %v4261_v30  ;;  %vm4269_vm5 = vcmp.lt.s32.totalorder %v4248_v40, 3 }
  0xa8   :  { %vm5637_vm2 = vcmp.le.f32.partialorder %v6946_v50, 0.7853982  ;;  %v4266_v19 = vor.u32 %v4265_v10, %v4264_v59  ;;  %vm4270_vm6 = vcmp.lt.s32.totalorder %v4248_v40, 4  ;;  %v2931_v8 = vclz %v4912_v14  ;;  %v5010_v23 = vpop.eup %5009 }
  0xa9   :  { %vm4268_vm7 = vcmp.lt.s32.totalorder %v4248_v40, 2  ;;  %v4272_v41 = vsel %vm4270_vm6, %v4260_v32, 2102212464  ;;  %vm222_vm8 = vcmp.eq.s32.totalorder %v5576_v29, 0  ;;  %v2950_v49 = vsel %vm2865_vm1, %v2949_v37, %v2925_v38 }
  0xaa   :  { %v4275_v6 = vsel %vm4267_vm3, %v4254_v21, %v4257_v47  ;;  %v4276_v60 = vsel %vm4270_vm6, %v4263_v33, 920167782  ;;  %vm225_vm11 = vcmp.eq.s32.totalorder %v5576_v29, 2  ;;  %v4913_v18 = vadd.s32 4294967294, %v2931_v8  ;;  %v5012_v37 = vpop.eup %5011 }
  0xab   :  { %v4271_v0 = vsel %vm4267_vm3, %v4251_v25, %v4254_v21  ;;  %v4273_v57 = vsel %vm4269_vm5, %v4257_v47, %v4272_v41  ;;  %v4277_v36 = vsel %vm4269_vm5, %v4260_v32, %v4276_v60  ;;  %v1579_v7 = vxor.u32 2147483648, %v1578_v28 }
  0xac   :  { %v4278_v30 = vsel %vm4268_vm7, %v4275_v6, %v4277_v36  ;;  %v4279_v12 = vsel %vm4267_vm3, %v4257_v47, %v4260_v32  ;;  %v4280_v38 = vsel %vm4270_vm6, %v4266_v19, 1326507024  ;;  %vm4914_vm9 = vcmp.lt.s32.totalorder %v4913_v18, 0 }
  0xad   :  { %v4281_v45 = vsel %vm4269_vm5, %v4263_v33, %v4280_v38  ;;  %v5657_v59 = vmul.u32.u64.low %v5628_v35, %v4278_v30  ;;  %v5658_v10 = vmul.u32.u64.high %v5628_v35, %v4278_v30, %v5657_v59  ;;  %v2934_v25 = vsel %vm4914_vm9, 0, %v4913_v18 }
  0xae   :  { %v4274_v21 = vsel %vm4268_vm7, %v4271_v0, %v4273_v57  ;;  %v4282_v50 = vsel %vm4268_vm7, %v4279_v12, %v4281_v45  ;;  %v5666_v47 = vsel %vm114_vm13, nan, %v5609_v5  ;;  %vm221_vm12 = vcmp.lt.s32.totalorder %v5576_v29, 2 }
  0xaf   :  { %v2935_v14 = vsub.s32 32, %v2934_v25  ;;  %v2936_v32 = vshll.u32 %v5620_v54, %v2934_v25  ;;  %v2939_v33 = vsub.s32 4294967266, %v2934_v25  ;;  %v223_v19 = vxor.u32 2147483648, %v5010_v23 }
  0xb0   :  { %v2952_v8 = vsel %vm5637_vm2, 0, %v2950_v49  ;;  %v5673_v41 = vmul.u32.u64.low %v5628_v35, %v4282_v50  ;;  %v5674_v6 = vmul.u32.u64.high %v5628_v35, %v4282_v50, %v5673_v41  ;;  %v226_v40 = vxor.u32 2147483648, %v5012_v37 }
  0xb1   :  { %vm218_vm14 = vweird.f32 %v5282_v61  ;;  %v1580_v5 = vsel %vm1497_vm4, %v1579_v7, %v1578_v28  ;;  %v2937_v60 = vshrl.u32 %v2919_v22, %v2935_v14  ;;  %v2940_v18 = vadd.s32 127, %v2939_v33 }
  0xb2   :  { %v4293_v0 = vadd.s32 1, %v5658_v10  ;;  %v4290_v54 = vmul.u32 %v5628_v35, %v4274_v21  ;;  %vm324_vm15 = vcmp.lt.s32.totalorder %v5287_v62, 2  ;;  %vm325_vm0 = vcmp.eq.s32.totalorder %v5287_v62, 0 }
  0xb3   :  { %vm328_vm3 = vcmp.eq.s32.totalorder %v5287_v62, 2  ;;  %v2938_v49 = vor.u32 %v2937_v60, %v2936_v32  ;;  %v2941_v57 = vshll.u32 %v2940_v18, 23  ;;  %v224_v36 = vsel %vm222_vm8, %v5012_v37, %v223_v19 }
  0xb4   :  { %v327_v22 = vsel %vm325_vm0, %v5374_v27, %v119_v58  ;;  %vm4292_vm4 = vc.u32 %v5674_v6, %v5657_v59  ;;  %v227_v35 = vsel %vm225_vm11, %v226_v40, %v5010_v23  ;;  %v330_v28 = vsel %vm328_vm3, %v122_v17, %v5382_v16 }
  0xb5   :  { %vm427_vm5 = vcmp.lt.s32.totalorder %v5554_v46, 2  ;;  %v2942_v62 = vor.u32 4788187, %v2941_v57  ;;  %v2945_v7 = vcvt.s32.f32 %v2938_v49  ;;  %v4294_v30 = vsel %vm4292_vm4, %v4293_v0, %v5658_v10 }
  0xb6   :  { %v331_v12 = vsel %vm324_vm15, %v327_v22, %v330_v28  ;;  %v4295_v38 = vadd.s32 %v4294_v30, %v4290_v54  ;;  %vm428_vm6 = vcmp.eq.s32.totalorder %v5554_v46, 0  ;;  %vm431_vm7 = vcmp.eq.s32.totalorder %v5554_v46, 2 }
  0xb7   :  { %v332_v58 = vsel %vm114_vm13, nan, %v331_v12  ;;  %v2943_v45 = vand.u32 2147483647, %v2942_v62  ;;  %v430_v25 = vsel %vm428_vm6, %v5012_v37, %v223_v19  ;;  %v433_v21 = vsel %vm431_vm7, %v226_v40, %v5010_v23 }
  0xb8   :  { %v1583_v27 = vsel %vm5530_vm10, %v5309_v15, %v1580_v5  ;;  %vm4237_vm8 = vcmp.lt.s32.totalorder %v5524_v24, 0  ;;  %v4296_v16 = vadd.s32 536870912, %v4295_v38  ;;  %v5031_v17 = vmov 1966171168  }
  0xb9   :  { %v439_v10 = vunpack.c.l.s4 %v5031_v17  ;;  %v441_v50 = vlaneseq  ;;  %v2946_v14 = vmul.f32 %v2945_v7, %v2943_v45  ;;  %v2956_v1 = vadd.s32 3, %v2952_v8 }
  0xba   :  { %v228_v32 = vsel %vm221_vm12, %v224_v36, %v227_v35  ;;  %v434_v33 = vsel %vm427_vm5, %v430_v25, %v433_v21  ;;  %v5710_v37 = vand.u32 3, %v2952_v8  ;;  %v4297_v23 = vshrl.u32 %v4296_v16, 30 }
  0xbb   :  { %v440_v19 = vunpack.c.0.s8 %v439_v10  ;;  %v5712_v26 = vshrl.u32 %v441_v50, 7  ;;  %5013 = vcosq.f32 %v1583_v27  ;;  %v2947_v41 = vxor.u32 2147483648, %v2946_v14 }
  0xbc   :  { %6949 = vst [vmem:[#allocation8_spill] sm:$0xff] %v5710_v37  ;;  %vm5716_vm10 = vcmp.le.f32.partialorder %v4235_v48, 0.7853982  ;;  %v6950_v40 = vmov 0  ;;  %v5721_v29 = vmul.f32 %v332_v58, %v5666_v47  ;;  %v4298_v5 = vshll.u32 %v4297_v23, 30 }
  0xbd   :  { %v6951_v40 = vsel %vm5716_vm10, 4294967295, %v6950_v40  ;;  %v5725_v46 = vsel %vm218_vm14, nan, %v228_v32  ;;  %v435_v8 = vsel %vm218_vm14, nan, %v434_v33  ;;  %v5730_v60 = vsub.s32 %v440_v19, %v5712_v26 }
  0xbe   :  { %6952 = vst [vmem:[#allocation9_spill] sm:$0xff] %v6951_v40  ;;  %5015 = vsinq.f32 %v1583_v27  ;;  %v2948_v48 = vsel %vm2865_vm1, %v2947_v41, %v2946_v14  ;;  %v5734_v18 = vand.u32 3, %v2956_v1  ;;  %v4321_v0 = vsub.s32 4, %v4297_v23 }
  0xbf   :  { %v5738_v54 = vadd.s32 %v5657_v59, %v5674_v6  ;;  %v5740_v49 = vsub.s32 %v4295_v38, %v4298_v5  ;;  %v444_v61 = vrot.slane %v5666_v47, %v5730_v60  ;;  %v5032_v57 = vmov 1983009808  }
  0xc0   :  { %v650_v36 = vunpack.c.l.s4 %v5032_v57  ;;  %v2951_v22 = vsel %vm5637_vm2, %v5329_v56, %v2948_v48  ;;  %v451_v35 = vrot.slane %v5725_v46, %v5730_v60  ;;  %v477_v28 = vrot.slane %v332_v58, %v5730_v60 }
  0xc1   :  { %v5751_v62 = vmul.f32 %v435_v8, %v5725_v46  ;;  %v4301_v59 = vsub.s32 0, %v5740_v49  ;;  %v5755_v6 = vsub.s32 0, %v5712_v26  ;;  %v5758_v7 = vsub.s32 1, %v5712_v26 }
  0xc2   :  { %vm622_vm1 = vcmask 1040384   ;;  %v5760_v30 = vmul.f32 %v332_v58, %v332_v58  ;;  %v4322_v39 = vsel %vm4237_vm8, %v4321_v0, %v4297_v23  ;;  %v452_v12 = vcombine.low %v444_v61, %v451_v35 }
  0xc3   :  { %v453_v38 = vcombine.high %v444_v61, %v451_v35  ;;  %v484_v45 = vrot.slane %v435_v8, %v5730_v60  ;;  %5017 = vcosq.f32 %v2951_v22  ;;  %v4937_v25 = vmin.u32 %v4301_v59, %v5740_v49 }
  0xc4   :  { %v5767_v21 = vsub.s32 2, %v5712_v26  ;;  %v5770_v27 = vsub.s32 3, %v5712_v26  ;;  %v5773_v16 = vrot.slane %v452_v12, %v5730_v60  ;;  %5019 = vsinq.f32 %v2951_v22 }
  0xc5   :  { %v5776_v58 = vrot.slane %v453_v38, %v5730_v60  ;;  %v485_v17 = vcombine.low %v477_v28, %v484_v45  ;;  %v486_v10 = vcombine.high %v477_v28, %v484_v45  ;;  %v4303_v50 = vclz %v4937_v25 }
  0xc6   :  { %v5780_v14 = vsel %vm5716_vm10, 0, %v4322_v39  ;;  %v651_v1 = vunpack.c.0.s8 %v650_v36  ;;  %v468_v32 = vcombine.high %v5773_v16, %v5773_v16  ;;  %v505_v19 = vrot.slane %v5773_v16, %v5755_v6 }
  0xc7   :  { %v5785_v33 = vrot.slane %v485_v17, %v5730_v60  ;;  %v5788_v23 = vrot.slane %v486_v10, %v5730_v60  ;;  %v4938_v41 = vadd.s32 4294967294, %v4303_v50  ;;  %v509_v5 = vrot.slane %v5773_v16, %v5758_v7 }
  0xc8   :  { %v521_v48 = vrot.slane %v5776_v58, %v5755_v6  ;;  %v525_v0 = vrot.slane %v5776_v58, %v5758_v7  ;;  %v537_v57 = vrot.slane %v468_v32, %v5755_v6  ;;  %v541_v36 = vrot.slane %v468_v32, %v5758_v7  ;;  %v5803_v35 = vpop.eup %5013 }
  0xc9   :  { %v501_v61 = vcombine.high %v5785_v33, %v5785_v33  ;;  %v545_v22 = vrot.slane %v468_v32, %v5767_v21  ;;  %vm4939_vm13 = vcmp.lt.s32.totalorder %v4938_v41, 0  ;;  %v549_v28 = vrot.slane %v468_v32, %v5770_v27 }
  0xca   :  { %v565_v59 = vrot.slane %v5785_v33, %v5755_v6  ;;  %v569_v39 = vrot.slane %v5785_v33, %v5758_v7  ;;  %v4306_v12 = vsel %vm4939_vm13, 0, %v4938_v41  ;;  %v581_v38 = vrot.slane %v5788_v23, %v5755_v6 }
  0xcb   :  { %v585_v45 = vrot.slane %v5788_v23, %v5758_v7  ;;  %v597_v25 = vrot.slane %v501_v61, %v5755_v6  ;;  %v5815_v17 = vpop.eup %5015  ;;  %v4311_v10 = vsub.s32 4294967266, %v4306_v12  ;;  %v5818_v50 = vadd.s32 3, %v5780_v14 }
  0xcc   :  { %v601_v32 = vrot.slane %v501_v61, %v5758_v7  ;;  %v754_v42 = vmul.f32 %v435_v8, %v435_v8  ;;  %v605_v43 = vrot.slane %v501_v61, %v5767_v21  ;;  %v609_v41 = vrot.slane %v501_v61, %v5770_v27 }
  0xcd   :  { %6953 = vst [vmem:[#allocation10_spill] sm:$0xff] %v5818_v50  ;;  %v623_v3 = vsel %vm622_vm1, %v505_v19, %v565_v59  ;;  %v624_v52 = vsel %vm622_vm1, %v509_v5, %v569_v39  ;;  %v627_v55 = vsel %vm622_vm1, %v521_v48, %v581_v38  ;;  %v628_v40 = vsel %vm622_vm1, %v525_v0, %v585_v45 }
  0xce   :  { %v5828_v37 = vsub.s32 %v651_v1, %v5712_v26  ;;  %v755_v50 = vmul.f32 %v5666_v47, %v5666_v47  ;;  %v631_v8 = vsel %vm622_vm1, %v537_v57, %v597_v25  ;;  %v632_v11 = vsel %vm622_vm1, %v541_v36, %v601_v32 }
  0xcf   :  { %v633_v61 = vsel %vm622_vm1, %v545_v22, %v605_v43  ;;  %v634_v19 = vsel %vm622_vm1, %v549_v28, %v609_v41  ;;  %v4307_v59 = vsub.s32 32, %v4306_v12  ;;  %v647_v5 = vcombine.low %v623_v3, %v624_v52 }
  0xd0   :  { %v664_v39 = vcombine.low %v627_v55, %v628_v40  ;;  %v756_v48 = vmul.f32 %v5725_v46, %v5725_v46  ;;  %v5838_v0 = vpop.eup %5017  ;;  %v4308_v26 = vshll.u32 %v5740_v49, %v4306_v12  ;;  %v4312_v1 = vadd.s32 127, %v4311_v10 }
  0xd1   :  { %6954 = vst [vmem:[#allocation11_spill] sm:$0xff] %v5838_v0  ;;  %v681_v47 = vcombine.low %v631_v8, %v632_v11  ;;  %v682_v38 = vcombine.low %v633_v61, %v634_v19  ;;  %v655_v57 = vrot.slane %v647_v5, %v5828_v37  ;;  %v513_v43 = vrot.slane %v5773_v16, %v5767_v21  ;;  %v5847_v52 = vpop.eup %5019 }
  0xd2   :  { %v672_v36 = vrot.slane %v664_v39, %v5828_v37  ;;  %v517_v3 = vrot.slane %v5773_v16, %v5770_v27  ;;  %v529_v11 = vrot.slane %v5776_v58, %v5767_v21  ;;  %v533_v46 = vrot.slane %v5776_v58, %v5770_v27 }
  0xd3   :  { %v689_v55 = vrot.slane %v681_v47, %v5828_v37  ;;  %v696_v40 = vrot.slane %v682_v38, %v5828_v37  ;;  %v4309_v49 = vshrl.u32 %v5738_v54, %v4307_v59  ;;  %v573_v28 = vrot.slane %v5785_v33, %v5767_v21 }
  0xd4   :  { %v4873_v22 = vcombine.low %v655_v57, %v672_v36  ;;  %v577_v16 = vrot.slane %v5785_v33, %v5770_v27  ;;  %v589_v45 = vrot.slane %v5788_v23, %v5767_v21  ;;  %v593_v25 = vrot.slane %v5788_v23, %v5770_v27 }
  0xd5   :  { %v697_v12 = vcombine.low %v689_v55, %v696_v40  ;;  %v5865_v10 = vmul.f32 2.0, %v5721_v29  ;;  %v4313_v58 = vshll.u32 %v4312_v1, 23  ;;  %v625_v32 = vsel %vm622_vm1, %v513_v43, %v573_v28 }
  0xd6   :  { %v707_v54 = vrot.slane %v4873_v22, %v5828_v37  ;;  %v626_v41 = vsel %vm622_vm1, %v517_v3, %v577_v16  ;;  %v629_v33 = vsel %vm622_vm1, %v529_v11, %v589_v45  ;;  %v630_v61 = vsel %vm622_vm1, %v533_v46, %v593_v25 }
  0xd7   :  { %v721_v8 = vrot.slane %v697_v12, %v5828_v37  ;;  %v648_v19 = vcombine.low %v625_v32, %v626_v41  ;;  %v5873_v59 = vor.u32 %v4309_v49, %v4308_v26  ;;  %v665_v23 = vcombine.low %v629_v33, %v630_v61 }
  0xd8   :  { %v4875_v5 = vcombine.low %v696_v40, %v696_v40  ;;  %v5876_v29 = vmul.f32 2.0, %v5751_v62  ;;  %v757_v38 = vsub.f32 %v5760_v30, %v755_v50  ;;  %v5881_v57 = vand.u32 3, %v5780_v14 }
  0xd9   :  { %v729_v39 = vcombine.low %v707_v54, %v721_v8  ;;  %v730_v1 = vcombine.high %v707_v54, %v721_v8  ;;  %v662_v47 = vrot.slane %v648_v19, %v5828_v37  ;;  %v679_v36 = vrot.slane %v665_v23, %v5828_v37 }
  0xda   :  { %6955 = vst [vmem:[#allocation12_spill] sm:$0xff] %v5881_v57  ;;  %v5884_v43 = vsub.f32 %v754_v42, %v756_v48  ;;  %v767_v26 = vrot.slane %v5865_v10, %v5730_v60  ;;  %v5888_v3 = vor.u32 4788187, %v4313_v58  ;;  %v774_v40 = vrot.slane %v5876_v29, %v5730_v60 }
  0xdb   :  { %v733_v62 = vrot.slane %v729_v39, 5  ;;  %v734_v55 = vrot.slane %v730_v1, 5  ;;  %v4874_v11 = vcombine.low %v662_v47, %v679_v36  ;;  %v728_v30 = vrot.slane %v4875_v5, %v5828_v37 }
  0xdc   :  { %v800_v14 = vrot.slane %v757_v38, %v5730_v60  ;;  %v807_v50 = vrot.slane %v5884_v43, %v5730_v60  ;;  %v775_v48 = vcombine.low %v767_v26, %v774_v40  ;;  %v776_v46 = vcombine.high %v767_v26, %v774_v40 }
  0xdd   :  { %741 = vst [vmem:[%s6915_s1] sm:$0xf8] %v733_v62  ;;  %745 = vst [vmem:[%s6915_s1 + $0x20] sm:$0x1] %v733_v62  ;;  %v1067_v49 = vmul.f32 %v757_v38, %v5865_v10  ;;  %v714_v22 = vrot.slane %v4874_v11, %v5828_v37  ;;  %v1068_v12 = vmul.f32 %v5884_v43, %v5876_v29  ;;  %vm1487_vm2 = vcmp.eq.s32.totalorder %v5326_v44, 0 }
  0xde   :  { %742 = vst [vmem:[%s6915_s1 + $0x8] sm:$0xf8] %v734_v55  ;;  %746 = vst [vmem:[%s6915_s1 + $0x28] sm:$0x1] %v734_v55  ;;  %v808_v28 = vcombine.low %v800_v14, %v807_v50  ;;  %v809_v16 = vcombine.high %v800_v14, %v807_v50  ;;  %v5914_v45 = vrot.slane %v775_v48, %v5730_v60  ;;  %vm1490_vm11 = vcmp.eq.s32.totalorder %v5326_v44, 2 }
  0xdf   :  { %v5917_v25 = vrot.slane %v776_v46, %v5730_v60  ;;  %v5919_v58 = vmul.f32 2.0, %v1067_v49  ;;  %v5921_v54 = vmul.f32 %v757_v38, %v757_v38  ;;  %v731_v32 = vcombine.low %v714_v22, %v728_v30 }
  0xe0   :  { %v732_v41 = vcombine.high %v714_v22, %v728_v30  ;;  %v816_v8 = vrot.slane %v808_v28, %v5730_v60  ;;  %v823_v33 = vrot.slane %v809_v16, %v5730_v60  ;;  %v791_v61 = vcombine.high %v5914_v45, %v5914_v45 }
  0xe1   :  { %v828_v19 = vrot.slane %v5914_v45, %v5755_v6  ;;  %v832_v23 = vrot.slane %v5914_v45, %v5758_v7  ;;  %v844_v5 = vrot.slane %v5917_v25, %v5755_v6  ;;  %v735_v39 = vrot.slane %v731_v32, 5 }
  0xe2   :  { %v736_v1 = vrot.slane %v732_v41, 5  ;;  %v824_v47 = vcombine.high %v816_v8, %v816_v8  ;;  %v848_v38 = vrot.slane %v5917_v25, %v5758_v7  ;;  %v860_v36 = vrot.slane %v791_v61, %v5755_v6 }
  0xe3   :  { %v864_v26 = vrot.slane %v791_v61, %v5758_v7  ;;  %v868_v62 = vrot.slane %v791_v61, %v5767_v21  ;;  %v872_v55 = vrot.slane %v791_v61, %v5770_v27  ;;  %743 = vst [vmem:[%s6915_s1 + $0x10] sm:$0xf8] %v735_v39  ;;  %747 = vst [vmem:[%s6915_s1 + $0x30] sm:$0x1] %v735_v39  ;;  %vm1486_vm9 = vcmp.lt.s32.totalorder %v5326_v44, 2 }
  0xe4   :  { %744 = vst [vmem:[%s6915_s1 + $0x18] sm:$0xf8] %v736_v1  ;;  %748 = vst [vmem:[%s6915_s1 + $0x38] sm:$0x1] %v736_v1  ;;  %v888_v40 = vrot.slane %v816_v8, %v5755_v6  ;;  %v892_v11 = vrot.slane %v816_v8, %v5758_v7  ;;  %v904_v30 = vrot.slane %v823_v33, %v5755_v6  ;;  %vm1483_vm12 = vweird.f32 %v5056_v2 }
  0xe5   :  { %v908_v14 = vrot.slane %v823_v33, %v5758_v7  ;;  %v920_v50 = vrot.slane %v824_v47, %v5755_v6  ;;  %v924_v48 = vrot.slane %v824_v47, %v5758_v7  ;;  %v928_v46 = vrot.slane %v824_v47, %v5767_v21 }
  0xe6   :  { %v932_v49 = vrot.slane %v824_v47, %v5770_v27  ;;  %v945_v22 = vsel %vm622_vm1, %v828_v19, %v888_v40  ;;  %v946_v28 = vsel %vm622_vm1, %v832_v23, %v892_v11  ;;  %v949_v16 = vsel %vm622_vm1, %v844_v5, %v904_v30 }
  0xe7   :  { %v950_v32 = vsel %vm622_vm1, %v848_v38, %v908_v14  ;;  %v953_v41 = vsel %vm622_vm1, %v860_v36, %v920_v50  ;;  %v954_v61 = vsel %vm622_vm1, %v864_v26, %v924_v48  ;;  %v955_v39 = vsel %vm622_vm1, %v868_v62, %v928_v46 }
  0xe8   :  { %v956_v1 = vsel %vm622_vm1, %v872_v55, %v932_v49  ;;  %v969_v42 = vcombine.low %v945_v22, %v946_v28  ;;  %v986_v57 = vcombine.low %v949_v16, %v950_v32  ;;  %v1003_v0 = vcombine.low %v953_v41, %v954_v61 }
  0xe9   :  { %v1004_v47 = vcombine.low %v955_v39, %v956_v1  ;;  %v836_v19 = vrot.slane %v5914_v45, %v5767_v21  ;;  %v840_v23 = vrot.slane %v5914_v45, %v5770_v27  ;;  %v852_v5 = vrot.slane %v5917_v25, %v5767_v21 }
  0xea   :  { %v856_v38 = vrot.slane %v5917_v25, %v5770_v27  ;;  %v977_v36 = vrot.slane %v969_v42, %v5828_v37  ;;  %v994_v26 = vrot.slane %v986_v57, %v5828_v37  ;;  %v1011_v62 = vrot.slane %v1003_v0, %v5828_v37 }
  0xeb   :  { %v1018_v55 = vrot.slane %v1004_v47, %v5828_v37  ;;  %v896_v40 = vrot.slane %v816_v8, %v5767_v21  ;;  %v900_v11 = vrot.slane %v816_v8, %v5770_v27  ;;  %v912_v45 = vrot.slane %v823_v33, %v5767_v21 }
  0xec   :  { %v916_v30 = vrot.slane %v823_v33, %v5770_v27  ;;  %v4876_v50 = vcombine.low %v977_v36, %v994_v26  ;;  %v1070_v25 = vmul.f32 2.0, %v1068_v12  ;;  %v4315_v33 = vand.u32 2147483647, %v5888_v3 }
  0xed   :  { %v1019_v14 = vcombine.low %v1011_v62, %v1018_v55  ;;  %v4878_v48 = vcombine.low %v1018_v55, %v1018_v55  ;;  %v947_v42 = vsel %vm622_vm1, %v836_v19, %v896_v40  ;;  %v948_v57 = vsel %vm622_vm1, %v840_v23, %v900_v11 }
  0xee   :  { %v951_v0 = vsel %vm622_vm1, %v852_v5, %v912_v45  ;;  %v952_v46 = vsel %vm622_vm1, %v856_v38, %v916_v30  ;;  %v1029_v49 = vrot.slane %v4876_v50, %v5828_v37  ;;  %v970_v22 = vcombine.low %v947_v42, %v948_v57 }
  0xef   :  { %v1043_v8 = vrot.slane %v1019_v14, %v5828_v37  ;;  %v987_v28 = vcombine.low %v951_v0, %v952_v46  ;;  %v1072_v16 = vmul.f32 %v5884_v43, %v5884_v43  ;;  %v1073_v12 = vmul.f32 %v5865_v10, %v5865_v10 }
  0xf0   :  { %v1074_v32 = vmul.f32 %v5876_v29, %v5876_v29  ;;  %v984_v39 = vrot.slane %v970_v22, %v5828_v37  ;;  %v1085_v3 = vrot.slane %v5919_v58, %v5730_v60  ;;  %v1092_v43 = vrot.slane %v1070_v25, %v5730_v60 }
  0xf1   :  { %v1051_v41 = vcombine.low %v1029_v49, %v1043_v8  ;;  %v1052_v61 = vcombine.high %v1029_v49, %v1043_v8  ;;  %v1001_v1 = vrot.slane %v987_v28, %v5828_v37  ;;  %v1075_v47 = vsub.f32 %v5921_v54, %v1073_v12 }
  0xf2   :  { %v1076_v19 = vsub.f32 %v1072_v16, %v1074_v32  ;;  %v1050_v38 = vrot.slane %v4878_v48, %v5828_v37  ;;  %v1093_v29 = vcombine.low %v1085_v3, %v1092_v43  ;;  %v1094_v36 = vcombine.high %v1085_v3, %v1092_v43 }
  0xf3   :  { %v1055_v23 = vrot.slane %v1051_v41, 7  ;;  %v1056_v5 = vrot.slane %v1052_v61, 7  ;;  %v4877_v10 = vcombine.low %v984_v39, %v1001_v1  ;;  %v1118_v26 = vrot.slane %v1075_v47, %v5730_v60 }
  0xf4   :  { %v1125_v62 = vrot.slane %v1076_v19, %v5730_v60  ;;  %v6956_v55 = vcvt.s32.f32 %v5873_v59  ;;  %v1488_v40 = vxor.u32 2147483648, %v5391_v34  ;;  %v6019_v11 = vrot.slane %v1093_v29, %v5730_v60 }
  0xf5   :  { %1063 = vst [vmem:[%s6915_s1 + $0x20] sm:$0x7e] %v1055_v23  ;;  %1064 = vst [vmem:[%s6915_s1 + $0x28] sm:$0x7e] %v1056_v5  ;;  %v1036_v58 = vrot.slane %v4877_v10, %v5828_v37  ;;  %v6022_v59 = vrot.slane %v1094_v36, %v5730_v60  ;;  %v1491_v25 = vxor.u32 2147483648, %v5386_v20  ;;  %vm1587_vm14 = vweird.f32 %v5309_v15 }
  0xf6   :  { %v6007_v54 = vmul.f32 %v6956_v55, %v4315_v33  ;;  %v1126_v45 = vcombine.low %v1118_v26, %v1125_v62  ;;  %v1127_v30 = vcombine.high %v1118_v26, %v1125_v62  ;;  %v6027_v48 = vsel %vm1487_vm2, %v5386_v20, %v1488_v40 }
  0xf7   :  { %v1053_v14 = vcombine.low %v1036_v58, %v1050_v38  ;;  %v1054_v50 = vcombine.high %v1036_v58, %v1050_v38  ;;  %v1109_v42 = vcombine.high %v6019_v11, %v6019_v11  ;;  %v1146_v46 = vrot.slane %v6019_v11, %v5755_v6 }
  0xf8   :  { %v1134_v57 = vrot.slane %v1126_v45, %v5730_v60  ;;  %v1141_v0 = vrot.slane %v1127_v30, %v5730_v60  ;;  %v1150_v22 = vrot.slane %v6019_v11, %v5758_v7  ;;  %v1162_v28 = vrot.slane %v6022_v59, %v5755_v6 }
  0xf9   :  { %v1057_v49 = vrot.slane %v1053_v14, 7  ;;  %v1058_v8 = vrot.slane %v1054_v50, 7  ;;  %v1166_v16 = vrot.slane %v6022_v59, %v5758_v7  ;;  %v1178_v12 = vrot.slane %v1109_v42, %v5755_v6 }
  0xfa   :  { %v1142_v33 = vcombine.high %v1134_v57, %v1134_v57  ;;  %v1182_v32 = vrot.slane %v1109_v42, %v5758_v7  ;;  %v1186_v41 = vrot.slane %v1109_v42, %v5767_v21  ;;  %v1190_v61 = vrot.slane %v1109_v42, %v5770_v27 }
  0xfb   :  { %1065 = vst [vmem:[%s6915_s1 + $0x30] sm:$0x7e] %v1057_v49  ;;  %1066 = vst [vmem:[%s6915_s1 + $0x38] sm:$0x7e] %v1058_v8  ;;  %v1206_v39 = vrot.slane %v1134_v57, %v5755_v6  ;;  %v1210_v1 = vrot.slane %v1134_v57, %v5758_v7  ;;  %v1222_v47 = vrot.slane %v1141_v0, %v5755_v6  ;;  %vm1590_vm15 = vcmp.lt.s32.totalorder %v5623_v13, 2 }
  0xfc   :  { %v1226_v19 = vrot.slane %v1141_v0, %v5758_v7  ;;  %v1238_v3 = vrot.slane %v1142_v33, %v5755_v6  ;;  %v1242_v43 = vrot.slane %v1142_v33, %v5758_v7  ;;  %v1246_v23 = vrot.slane %v1142_v33, %v5767_v21 }
  0xfd   :  { %v1250_v5 = vrot.slane %v1142_v33, %v5770_v27  ;;  %v1263_v10 = vsel %vm622_vm1, %v1146_v46, %v1206_v39  ;;  %v1264_v38 = vsel %vm622_vm1, %v1150_v22, %v1210_v1  ;;  %v1267_v29 = vsel %vm622_vm1, %v1162_v28, %v1222_v47 }
  0xfe   :  { %v1268_v36 = vsel %vm622_vm1, %v1166_v16, %v1226_v19  ;;  %v1271_v26 = vsel %vm622_vm1, %v1178_v12, %v1238_v3  ;;  %v1272_v62 = vsel %vm622_vm1, %v1182_v32, %v1242_v43  ;;  %v1273_v55 = vsel %vm622_vm1, %v1186_v41, %v1246_v23 }
  0xff   :  { %v1274_v58 = vsel %vm622_vm1, %v1190_v61, %v1250_v5  ;;  %v1287_v45 = vcombine.low %v1263_v10, %v1264_v38  ;;  %v1304_v30 = vcombine.low %v1267_v29, %v1268_v36  ;;  %v1321_v14 = vcombine.low %v1271_v26, %v1272_v62 }
 0x100   :  { %v1322_v50 = vcombine.low %v1273_v55, %v1274_v58  ;;  %v1154_v42 = vrot.slane %v6019_v11, %v5767_v21  ;;  %v1158_v46 = vrot.slane %v6019_v11, %v5770_v27  ;;  %v1170_v22 = vrot.slane %v6022_v59, %v5767_v21 }
 0x101   :  { %v1295_v49 = vrot.slane %v1287_v45, %v5828_v37  ;;  %v1312_v8 = vrot.slane %v1304_v30, %v5828_v37  ;;  %v1174_v28 = vrot.slane %v6022_v59, %v5770_v27  ;;  %v1329_v33 = vrot.slane %v1321_v14, %v5828_v37 }
 0x102   :  { %v1336_v16 = vrot.slane %v1322_v50, %v5828_v37  ;;  %v1214_v12 = vrot.slane %v1134_v57, %v5767_v21  ;;  %v1218_v11 = vrot.slane %v1134_v57, %v5770_v27  ;;  %v1230_v41 = vrot.slane %v1141_v0, %v5767_v21 }
 0x103   :  { %v4879_v32 = vcombine.low %v1295_v49, %v1312_v8  ;;  %v1234_v61 = vrot.slane %v1141_v0, %v5770_v27  ;;  %v1492_v59 = vsel %vm1490_vm11, %v1491_v25, %v5391_v34  ;;  %vm1591_vm0 = vcmp.eq.s32.totalorder %v5623_v13, 0 }
 0x104   :  { %v1337_v39 = vcombine.low %v1329_v33, %v1336_v16  ;;  %v1265_v1 = vsel %vm622_vm1, %v1154_v42, %v1214_v12  ;;  %v1266_v47 = vsel %vm622_vm1, %v1158_v46, %v1218_v11  ;;  %v4881_v19 = vcombine.low %v1336_v16, %v1336_v16 }
 0x105   :  { %v1347_v3 = vrot.slane %v4879_v32, %v5828_v37  ;;  %v1269_v57 = vsel %vm622_vm1, %v1170_v22, %v1230_v41  ;;  %v1270_v43 = vsel %vm622_vm1, %v1174_v28, %v1234_v61  ;;  %v1288_v23 = vcombine.low %v1265_v1, %v1266_v47 }
 0x106   :  { %v1361_v0 = vrot.slane %v1337_v39, %v5828_v37  ;;  %v1305_v5 = vcombine.low %v1269_v57, %v1270_v43  ;;  %v1368_v10 = vrot.slane %v4881_v19, %v5828_v37  ;;  %v1493_v38 = vsel %vm1486_vm9, %v6027_v48, %v1492_v59 }
 0x107   :  { %v1302_v29 = vrot.slane %v1288_v23, %v5828_v37  ;;  %v1494_v36 = vsel %vm1483_vm12, nan, %v1493_v38  ;;  %v1592_v58 = vxor.u32 2147483648, %v5815_v17  ;;  %vm1594_vm3 = vcmp.eq.s32.totalorder %v5623_v13, 2 }
 0x108   :  { %v1369_v26 = vcombine.low %v1347_v3, %v1361_v0  ;;  %v1370_v62 = vcombine.high %v1347_v3, %v1361_v0  ;;  %v1319_v55 = vrot.slane %v1305_v5, %v5828_v37  ;;  %v1595_v44 = vxor.u32 2147483648, %v5803_v35 }
 0x109   :  { %vm1693_vm4 = vcmp.lt.s32.totalorder %v5322_v51, 2  ;;  %vm1694_vm5 = vcmp.eq.s32.totalorder %v5322_v51, 0  ;;  %v1593_v14 = vsel %vm1591_vm0, %v5803_v35, %v1592_v58  ;;  %vm1697_vm6 = vcmp.eq.s32.totalorder %v5322_v51, 2 }
 0x10a   :  { %v1373_v48 = vrot.slane %v1369_v26, 1  ;;  %v1374_v45 = vrot.slane %v1370_v62, 1  ;;  %v4880_v30 = vcombine.low %v1302_v29, %v1319_v55  ;;  %v1596_v50 = vsel %vm1594_vm3, %v1595_v44, %v5815_v17 }
 0x10b   :  { %v1696_v42 = vsel %vm1694_vm5, %v5386_v20, %v1488_v40  ;;  %vm1796_vm7 = vcmp.lt.s32.totalorder %v5611_v53, 2  ;;  %v1597_v46 = vsel %vm1590_vm15, %v1593_v14, %v1596_v50  ;;  %v1699_v49 = vsel %vm1697_vm6, %v1491_v25, %v5391_v34 }
 0x10c   :  { %1381 = vst [vmem:[%s6915_s1 + $0x20] sm:$0x80] %v1373_v48  ;;  %1385 = vst [vmem:[%s6915_s1 + $0x40] sm:$0x1f] %v1373_v48  ;;  %v1354_v40 = vrot.slane %v4880_v30, %v5828_v37  ;;  %vm1797_vm13 = vcmp.eq.s32.totalorder %v5611_v53, 0  ;;  %v1598_v8 = vsel %vm1587_vm14, nan, %v1597_v46  ;;  %v1700_v22 = vsel %vm1693_vm4, %v1696_v42, %v1699_v49 }
 0x10d   :  { %1382 = vst [vmem:[%s6915_s1 + $0x28] sm:$0x80] %v1374_v45  ;;  %1386 = vst [vmem:[%s6915_s1 + $0x48] sm:$0x1f] %v1374_v45  ;;  %v1799_v28 = vsel %vm1797_vm13, %v5803_v35, %v1592_v58  ;;  %vm1800_vm2 = vcmp.eq.s32.totalorder %v5611_v53, 2  ;;  %v1701_v13 = vsel %vm1483_vm12, nan, %v1700_v22  ;;  %v1813_v25 = vrot.slane %v1494_v36, %v5730_v60 }
 0x10e   :  { %v1371_v33 = vcombine.low %v1354_v40, %v1368_v10  ;;  %v1372_v16 = vcombine.high %v1354_v40, %v1368_v10  ;;  %v1802_v20 = vsel %vm1800_vm2, %v1595_v44, %v5815_v17  ;;  %v1820_v12 = vrot.slane %v1598_v8, %v5730_v60 }
 0x10f   :  { %v1803_v34 = vsel %vm1796_vm7, %v1799_v28, %v1802_v20  ;;  %v1846_v51 = vrot.slane %v1701_v13, %v5730_v60  ;;  %v2117_v41 = vmul.f32 %v1701_v13, %v1494_v36  ;;  %v2121_v15 = vmul.f32 %v1701_v13, %v1701_v13 }
 0x110   :  { %v1375_v11 = vrot.slane %v1371_v33, 1  ;;  %v1376_v35 = vrot.slane %v1372_v16, 1  ;;  %v1804_v32 = vsel %vm1587_vm14, nan, %v1803_v34  ;;  %v1821_v61 = vcombine.low %v1813_v25, %v1820_v12 }
 0x111   :  { %v1822_v2 = vcombine.high %v1813_v25, %v1820_v12  ;;  %v1853_v59 = vrot.slane %v1804_v32, %v5730_v60  ;;  %v2118_v17 = vmul.f32 %v1804_v32, %v1598_v8  ;;  %v2122_v53 = vmul.f32 %v1804_v32, %v1804_v32 }
 0x112   :  { %1383 = vst [vmem:[%s6915_s1 + $0x30] sm:$0x80] %v1375_v11  ;;  %1387 = vst [vmem:[%s6915_s1 + $0x50] sm:$0x1f] %v1375_v11  ;;  %v2123_v39 = vmul.f32 %v1494_v36, %v1494_v36  ;;  %v2124_v1 = vmul.f32 %v1598_v8, %v1598_v8  ;;  %v1829_v47 = vrot.slane %v1821_v61, %v5730_v60  ;;  %v6171_v43 = vmul.f32 2.0, %v2117_v41 }
 0x113   :  { %1384 = vst [vmem:[%s6915_s1 + $0x38] sm:$0x80] %v1376_v35  ;;  %1388 = vst [vmem:[%s6915_s1 + $0x58] sm:$0x1f] %v1376_v35  ;;  %v1836_v19 = vrot.slane %v1822_v2, %v5730_v60  ;;  %v1854_v3 = vcombine.low %v1846_v51, %v1853_v59  ;;  %v1855_v57 = vcombine.high %v1846_v51, %v1853_v59  ;;  %v6173_v23 = vmul.f32 2.0, %v2118_v17 }
 0x114   :  { %v6175_v0 = vsub.f32 %v2121_v15, %v2123_v39  ;;  %v6177_v5 = vsub.f32 %v2122_v53, %v2124_v1  ;;  %v1837_v10 = vcombine.high %v1829_v47, %v1829_v47  ;;  %v1874_v36 = vrot.slane %v1829_v47, %v5755_v6 }
 0x115   :  { %v1862_v38 = vrot.slane %v1854_v3, %v5730_v60  ;;  %v1869_v29 = vrot.slane %v1855_v57, %v5730_v60  ;;  %v1878_v26 = vrot.slane %v1829_v47, %v5758_v7  ;;  %v1890_v62 = vrot.slane %v1836_v19, %v5755_v6 }
 0x116   :  { %v1894_v55 = vrot.slane %v1836_v19, %v5758_v7  ;;  %v1882_v58 = vrot.slane %v1829_v47, %v5767_v21  ;;  %v1906_v48 = vrot.slane %v1837_v10, %v5755_v6  ;;  %v1910_v45 = vrot.slane %v1837_v10, %v5758_v7 }
 0x117   :  { %v1870_v44 = vcombine.high %v1862_v38, %v1862_v38  ;;  %v1914_v30 = vrot.slane %v1837_v10, %v5767_v21  ;;  %v1918_v14 = vrot.slane %v1837_v10, %v5770_v27  ;;  %v1934_v50 = vrot.slane %v1862_v38, %v5755_v6 }
 0x118   :  { %v1938_v42 = vrot.slane %v1862_v38, %v5758_v7  ;;  %v1950_v40 = vrot.slane %v1869_v29, %v5755_v6  ;;  %v1954_v46 = vrot.slane %v1869_v29, %v5758_v7  ;;  %v1886_v61 = vrot.slane %v1829_v47, %v5770_v27 }
 0x119   :  { %v1966_v49 = vrot.slane %v1870_v44, %v5755_v6  ;;  %v1970_v8 = vrot.slane %v1870_v44, %v5758_v7  ;;  %v1974_v22 = vrot.slane %v1870_v44, %v5767_v21  ;;  %v1978_v28 = vrot.slane %v1870_v44, %v5770_v27 }
 0x11a   :  { %v1991_v33 = vsel %vm622_vm1, %v1874_v36, %v1934_v50  ;;  %v1992_v16 = vsel %vm622_vm1, %v1878_v26, %v1938_v42  ;;  %v1995_v13 = vsel %vm622_vm1, %v1890_v62, %v1950_v40  ;;  %v1996_v20 = vsel %vm622_vm1, %v1894_v55, %v1954_v46 }
 0x11b   :  { %v1999_v34 = vsel %vm622_vm1, %v1906_v48, %v1966_v49  ;;  %v2000_v25 = vsel %vm622_vm1, %v1910_v45, %v1970_v8  ;;  %v2001_v12 = vsel %vm622_vm1, %v1914_v30, %v1974_v22  ;;  %v2002_v51 = vsel %vm622_vm1, %v1918_v14, %v1978_v28 }
 0x11c   :  { %v2015_v11 = vcombine.low %v1991_v33, %v1992_v16  ;;  %v2032_v35 = vcombine.low %v1995_v13, %v1996_v20  ;;  %v2049_v32 = vcombine.low %v1999_v34, %v2000_v25  ;;  %v2050_v41 = vcombine.low %v2001_v12, %v2002_v51 }
 0x11d   :  { %v1898_v2 = vrot.slane %v1836_v19, %v5767_v21  ;;  %v1902_v59 = vrot.slane %v1836_v19, %v5770_v27  ;;  %v1942_v39 = vrot.slane %v1862_v38, %v5767_v21  ;;  %v1946_v3 = vrot.slane %v1862_v38, %v5770_v27 }
 0x11e   :  { %v2023_v17 = vrot.slane %v2015_v11, %v5828_v37  ;;  %v2040_v15 = vrot.slane %v2032_v35, %v5828_v37  ;;  %v2057_v53 = vrot.slane %v2049_v32, %v5828_v37  ;;  %v2064_v1 = vrot.slane %v2050_v41, %v5828_v37 }
 0x11f   :  { %v1958_v57 = vrot.slane %v1869_v29, %v5767_v21  ;;  %v1962_v47 = vrot.slane %v1869_v29, %v5770_v27  ;;  %v1993_v36 = vsel %vm622_vm1, %v1882_v58, %v1942_v39  ;;  %v2135_v19 = vrot.slane %v6171_v43, %v5730_v60 }
 0x120   :  { %v4898_v10 = vcombine.low %v2023_v17, %v2040_v15  ;;  %v2142_v26 = vrot.slane %v6173_v23, %v5730_v60  ;;  %v2065_v62 = vcombine.low %v2057_v53, %v2064_v1  ;;  %v1994_v55 = vsel %vm622_vm1, %v1886_v61, %v1946_v3 }
 0x121   :  { %v1997_v44 = vsel %vm622_vm1, %v1898_v2, %v1958_v57  ;;  %v1998_v38 = vsel %vm622_vm1, %v1902_v59, %v1962_v47  ;;  %v2016_v45 = vcombine.low %v1993_v36, %v1994_v55  ;;  %v4900_v30 = vcombine.low %v2064_v1, %v2064_v1 }
 0x122   :  { %v2075_v48 = vrot.slane %v4898_v10, %v5828_v37  ;;  %v2033_v29 = vcombine.low %v1997_v44, %v1998_v38  ;;  %v2089_v58 = vrot.slane %v2065_v62, %v5828_v37  ;;  %v2143_v14 = vcombine.low %v2135_v19, %v2142_v26 }
 0x123   :  { %v2144_v50 = vcombine.high %v2135_v19, %v2142_v26  ;;  %v2168_v42 = vrot.slane %v6175_v0, %v5730_v60  ;;  %v2030_v40 = vrot.slane %v2016_v45, %v5828_v37  ;;  %v2096_v49 = vrot.slane %v4900_v30, %v5828_v37 }
 0x124   :  { %v2047_v46 = vrot.slane %v2033_v29, %v5828_v37  ;;  %v2175_v8 = vrot.slane %v6177_v5, %v5730_v60  ;;  %v2097_v22 = vcombine.low %v2075_v48, %v2089_v58  ;;  %v2098_v28 = vcombine.high %v2075_v48, %v2089_v58 }
 0x125   :  { %v6235_v33 = vrot.slane %v2143_v14, %v5730_v60  ;;  %v6238_v16 = vrot.slane %v2144_v50, %v5730_v60  ;;  %v6242_v25 = vmul.f32 %v6175_v0, %v6171_v43  ;;  %vm2858_vm11 = vcmp.eq.s32.totalorder %v5339_v9, 2 }
 0x126   :  { %v4899_v13 = vcombine.low %v2030_v40, %v2047_v46  ;;  %v2176_v20 = vcombine.low %v2168_v42, %v2175_v8  ;;  %v2177_v34 = vcombine.high %v2168_v42, %v2175_v8  ;;  %v2101_v12 = vrot.slane %v2097_v22, 3 }
 0x127   :  { %v2102_v51 = vrot.slane %v2098_v28, 3  ;;  %v2159_v11 = vcombine.high %v6235_v33, %v6235_v33  ;;  %v2196_v35 = vrot.slane %v6235_v33, %v5755_v6  ;;  %v2200_v2 = vrot.slane %v6235_v33, %v5758_v7 }
 0x128   :  { %v2082_v32 = vrot.slane %v4899_v13, %v5828_v37  ;;  %v2184_v41 = vrot.slane %v2176_v20, %v5730_v60  ;;  %v2191_v61 = vrot.slane %v2177_v34, %v5730_v60  ;;  %2109 = vst [vmem:[%s6915_s1 + $0x60] ss:$-28 sps:$4 sm:$0xe7] %v2101_v12   ;;  %v2212_v59 = vrot.slane %v6238_v16, %v5755_v6 }
 0x129   :  { %2110 = vst [vmem:[%s6915_s1 + $0x68] ss:$-28 sps:$4 sm:$0xe7] %v2102_v51   ;;  %v2216_v17 = vrot.slane %v6238_v16, %v5758_v7  ;;  %v2228_v15 = vrot.slane %v2159_v11, %v5755_v6  ;;  %v2232_v53 = vrot.slane %v2159_v11, %v5758_v7  ;;  %v2236_v57 = vrot.slane %v2159_v11, %v5767_v21 }
 0x12a   :  { %v2099_v39 = vcombine.low %v2082_v32, %v2096_v49  ;;  %v2100_v1 = vcombine.high %v2082_v32, %v2096_v49  ;;  %v2192_v3 = vcombine.high %v2184_v41, %v2184_v41  ;;  %v2240_v47 = vrot.slane %v2159_v11, %v5770_v27 }
 0x12b   :  { %v2256_v10 = vrot.slane %v2184_v41, %v5755_v6  ;;  %v2260_v36 = vrot.slane %v2184_v41, %v5758_v7  ;;  %v2272_v19 = vrot.slane %v2191_v61, %v5755_v6  ;;  %v2276_v55 = vrot.slane %v2191_v61, %v5758_v7 }
 0x12c   :  { %v2103_v26 = vrot.slane %v2099_v39, 3  ;;  %v2104_v62 = vrot.slane %v2100_v1, 3  ;;  %v2288_v44 = vrot.slane %v2192_v3, %v5755_v6  ;;  %v2292_v38 = vrot.slane %v2192_v3, %v5758_v7 }
 0x12d   :  { %v2296_v48 = vrot.slane %v2192_v3, %v5767_v21  ;;  %v2300_v45 = vrot.slane %v2192_v3, %v5770_v27  ;;  %v2313_v29 = vsel %vm622_vm1, %v2196_v35, %v2256_v10  ;;  %v2314_v30 = vsel %vm622_vm1, %v2200_v2, %v2260_v36 }
 0x12e   :  { %2111 = vst [vmem:[%s6915_s1 + $0x70] ss:$-28 sps:$4 sm:$0xe7] %v2103_v26   ;;  %2112 = vst [vmem:[%s6915_s1 + $0x78] ss:$-28 sps:$4 sm:$0xe7] %v2104_v62   ;;  %v2317_v58 = vsel %vm622_vm1, %v2212_v59, %v2272_v19  ;;  %v2318_v14 = vsel %vm622_vm1, %v2216_v17, %v2276_v55  ;;  %v2321_v50 = vsel %vm622_vm1, %v2228_v15, %v2288_v44  ;;  %vm2851_vm12 = vweird.f32 %v5061_v4 }
 0x12f   :  { %v2322_v42 = vsel %vm622_vm1, %v2232_v53, %v2292_v38  ;;  %v2323_v40 = vsel %vm622_vm1, %v2236_v57, %v2296_v48  ;;  %v2324_v46 = vsel %vm622_vm1, %v2240_v47, %v2300_v45  ;;  %v2337_v49 = vcombine.low %v2313_v29, %v2314_v30 }
 0x130   :  { %v2354_v8 = vcombine.low %v2317_v58, %v2318_v14  ;;  %v2371_v22 = vcombine.low %v2321_v50, %v2322_v42  ;;  %v2372_v28 = vcombine.low %v2323_v40, %v2324_v46  ;;  %v2204_v13 = vrot.slane %v6235_v33, %v5767_v21 }
 0x131   :  { %v2345_v20 = vrot.slane %v2337_v49, %v5828_v37  ;;  %v2208_v34 = vrot.slane %v6235_v33, %v5770_v27  ;;  %v2220_v12 = vrot.slane %v6238_v16, %v5767_v21  ;;  %v2224_v51 = vrot.slane %v6238_v16, %v5770_v27 }
 0x132   :  { %v2362_v11 = vrot.slane %v2354_v8, %v5828_v37  ;;  %v2379_v35 = vrot.slane %v2371_v22, %v5828_v37  ;;  %v2386_v32 = vrot.slane %v2372_v28, %v5828_v37  ;;  %v2264_v2 = vrot.slane %v2184_v41, %v5767_v21 }
 0x133   :  { %v2268_v59 = vrot.slane %v2184_v41, %v5770_v27  ;;  %v2280_v17 = vrot.slane %v2191_v61, %v5767_v21  ;;  %v2284_v33 = vrot.slane %v2191_v61, %v5770_v27  ;;  %v2440_v15 = vmul.f32 %v6177_v5, %v6173_v23 }
 0x134   :  { %v2387_v53 = vcombine.low %v2379_v35, %v2386_v32  ;;  %v4901_v39 = vcombine.low %v2345_v20, %v2362_v11  ;;  %v2315_v16 = vsel %vm622_vm1, %v2204_v13, %v2264_v2  ;;  %v4903_v1 = vcombine.low %v2386_v32, %v2386_v32 }
 0x135   :  { %v2316_v3 = vsel %vm622_vm1, %v2208_v34, %v2268_v59  ;;  %v2319_v57 = vsel %vm622_vm1, %v2220_v12, %v2280_v17  ;;  %v2320_v47 = vsel %vm622_vm1, %v2224_v51, %v2284_v33  ;;  %v2441_v41 = vmul.f32 2.0, %v6242_v25 }
 0x136   :  { %v2397_v10 = vrot.slane %v4901_v39, %v5828_v37  ;;  %v2411_v61 = vrot.slane %v2387_v53, %v5828_v37  ;;  %v2338_v36 = vcombine.low %v2315_v16, %v2316_v3  ;;  %v2355_v19 = vcombine.low %v2319_v57, %v2320_v47 }
 0x137   :  { %v4319_v26 = vxor.u32 2147483648, %v6007_v54  ;;  %v2442_v62 = vmul.f32 2.0, %v2440_v15  ;;  %v2443_v55 = vmul.f32 %v6175_v0, %v6175_v0  ;;  %v2444_v44 = vmul.f32 %v6177_v5, %v6177_v5 }
 0x138   :  { %v2419_v38 = vcombine.low %v2397_v10, %v2411_v61  ;;  %v2420_v48 = vcombine.high %v2397_v10, %v2411_v61  ;;  %v2352_v45 = vrot.slane %v2338_v36, %v5828_v37  ;;  %v2369_v25 = vrot.slane %v2355_v19, %v5828_v37 }
 0x139   :  { %v2445_v29 = vmul.f32 %v6171_v43, %v6171_v43  ;;  %v2446_v30 = vmul.f32 %v6173_v23, %v6173_v23  ;;  %v2457_v58 = vrot.slane %v2441_v41, %v5730_v60  ;;  %v2464_v14 = vrot.slane %v2442_v62, %v5730_v60 }
 0x13a   :  { %v2423_v0 = vrot.slane %v2419_v38, 5  ;;  %v2424_v50 = vrot.slane %v2420_v48, 5  ;;  %v4902_v42 = vcombine.low %v2352_v45, %v2369_v25  ;;  %v2418_v5 = vrot.slane %v4903_v1, %v5828_v37 }
 0x13b   :  { %v2447_v40 = vsub.f32 %v2443_v55, %v2445_v29  ;;  %v2448_v46 = vsub.f32 %v2444_v44, %v2446_v30  ;;  %v2465_v49 = vcombine.low %v2457_v58, %v2464_v14  ;;  %v2466_v8 = vcombine.high %v2457_v58, %v2464_v14 }
 0x13c   :  { %v6331_v43 = vsel %vm4237_vm8, %v4319_v26, %v6007_v54  ;;  %2431 = vst [vmem:[%s6915_s1 + $0x60] sm:$0xf8] %v2423_v0  ;;  %2435 = vst [vmem:[%s6915_s1 + $0x80] sm:$0x1] %v2423_v0  ;;  %v2404_v23 = vrot.slane %v4902_v42, %v5828_v37  ;;  %vm2855_vm8 = vcmp.eq.s32.totalorder %v5339_v9, 0  ;;  %v2856_v54 = vxor.u32 2147483648, %v5526_v31 }
 0x13d   :  { %2432 = vst [vmem:[%s6915_s1 + $0x68] sm:$0xf8] %v2424_v50  ;;  %2436 = vst [vmem:[%s6915_s1 + $0x88] sm:$0x1] %v2424_v50  ;;  %v6349_v22 = vrot.slane %v2465_v49, %v5730_v60  ;;  %v6352_v28 = vrot.slane %v2466_v8, %v5730_v60  ;;  %v2490_v13 = vrot.slane %v2447_v40, %v5730_v60  ;;  %v2859_v11 = vxor.u32 2147483648, %v5513_v63 }
 0x13e   :  { %v2497_v20 = vrot.slane %v2448_v46, %v5730_v60  ;;  %v2421_v34 = vcombine.low %v2404_v23, %v2418_v5  ;;  %v2422_v12 = vcombine.high %v2404_v23, %v2418_v5  ;;  %v6359_v51 = vsel %vm2855_vm8, %v5513_v63, %v2856_v54 }
 0x13f   :  { %v2481_v35 = vcombine.high %v6349_v22, %v6349_v22  ;;  %v2518_v59 = vrot.slane %v6349_v22, %v5755_v6  ;;  %v2522_v15 = vrot.slane %v6349_v22, %v5758_v7  ;;  %v2534_v53 = vrot.slane %v6352_v28, %v5755_v6 }
 0x140   :  { %v2498_v32 = vcombine.low %v2490_v13, %v2497_v20  ;;  %v2499_v2 = vcombine.high %v2490_v13, %v2497_v20  ;;  %v2425_v17 = vrot.slane %v2421_v34, 5  ;;  %v2426_v33 = vrot.slane %v2422_v12, 5 }
 0x141   :  { %v2538_v1 = vrot.slane %v6352_v28, %v5758_v7  ;;  %v2550_v3 = vrot.slane %v2481_v35, %v5755_v6  ;;  %v2554_v57 = vrot.slane %v2481_v35, %v5758_v7  ;;  %v2558_v47 = vrot.slane %v2481_v35, %v5767_v21 }
 0x142   :  { %v2506_v39 = vrot.slane %v2498_v32, %v5730_v60  ;;  %v2513_v16 = vrot.slane %v2499_v2, %v5730_v60  ;;  %2433 = vst [vmem:[%s6915_s1 + $0x70] sm:$0xf8] %v2425_v17  ;;  %2437 = vst [vmem:[%s6915_s1 + $0x90] sm:$0x1] %v2425_v17  ;;  %v2562_v41 = vrot.slane %v2481_v35, %v5770_v27  ;;  %vm2854_vm9 = vcmp.lt.s32.totalorder %v5339_v9, 2 }
 0x143   :  { %2434 = vst [vmem:[%s6915_s1 + $0x78] sm:$0xf8] %v2426_v33  ;;  %2438 = vst [vmem:[%s6915_s1 + $0x98] sm:$0x1] %v2426_v33  ;;  %v2526_v10 = vrot.slane %v6349_v22, %v5767_v21  ;;  %v2530_v55 = vrot.slane %v6349_v22, %v5770_v27  ;;  %v2542_v44 = vrot.slane %v6352_v28, %v5767_v21  ;;  %vm2955_vm14 = vweird.f32 %v5329_v56 }
 0x144   :  { %v2514_v61 = vcombine.high %v2506_v39, %v2506_v39  ;;  %v2578_v36 = vrot.slane %v2506_v39, %v5755_v6  ;;  %v2582_v19 = vrot.slane %v2506_v39, %v5758_v7  ;;  %v2594_v26 = vrot.slane %v2513_v16, %v5755_v6 }
 0x145   :  { %v2598_v62 = vrot.slane %v2513_v16, %v5758_v7  ;;  %v2546_v38 = vrot.slane %v6352_v28, %v5770_v27  ;;  %v2586_v22 = vrot.slane %v2506_v39, %v5767_v21  ;;  %v2590_v28 = vrot.slane %v2506_v39, %v5770_v27 }
 0x146   :  { %v2610_v48 = vrot.slane %v2514_v61, %v5755_v6  ;;  %v2614_v45 = vrot.slane %v2514_v61, %v5758_v7  ;;  %v2618_v25 = vrot.slane %v2514_v61, %v5767_v21  ;;  %v2622_v29 = vrot.slane %v2514_v61, %v5770_v27 }
 0x147   :  { %v2635_v30 = vsel %vm622_vm1, %v2518_v59, %v2578_v36  ;;  %v2636_v58 = vsel %vm622_vm1, %v2522_v15, %v2582_v19  ;;  %v2639_v14 = vsel %vm622_vm1, %v2534_v53, %v2594_v26  ;;  %v2640_v0 = vsel %vm622_vm1, %v2538_v1, %v2598_v62 }
 0x148   :  { %v2643_v50 = vsel %vm622_vm1, %v2550_v3, %v2610_v48  ;;  %v2644_v42 = vsel %vm622_vm1, %v2554_v57, %v2614_v45  ;;  %v2645_v5 = vsel %vm622_vm1, %v2558_v47, %v2618_v25  ;;  %v2646_v40 = vsel %vm622_vm1, %v2562_v41, %v2622_v29  ;;  %v6958_v25 = vld [vmem:[#allocation3_spill] sm:$0xff] }
 0x149   :  { %v2659_v46 = vcombine.low %v2635_v30, %v2636_v58  ;;  %v2676_v49 = vcombine.low %v2639_v14, %v2640_v0  ;;  %v2693_v8 = vcombine.low %v2643_v50, %v2644_v42  ;;  %v2694_v23 = vcombine.low %v2645_v5, %v2646_v40  ;;  %v6959_v14 = vld [vmem:[#allocation8_spill] sm:$0xff] }
 0x14a   :  { %v2602_v13 = vrot.slane %v2513_v16, %v5767_v21  ;;  %v2606_v20 = vrot.slane %v2513_v16, %v5770_v27  ;;  %v2637_v2 = vsel %vm622_vm1, %v2526_v10, %v2586_v22  ;;  %v2638_v59 = vsel %vm622_vm1, %v2530_v55, %v2590_v28 }
 0x14b   :  { %v2667_v34 = vrot.slane %v2659_v46, %v5828_v37  ;;  %v2684_v12 = vrot.slane %v2676_v49, %v5828_v37  ;;  %v2701_v35 = vrot.slane %v2693_v8, %v5828_v37  ;;  %v2708_v32 = vrot.slane %v2694_v23, %v5828_v37 }
 0x14c   :  { %v2641_v17 = vsel %vm622_vm1, %v2542_v44, %v2602_v13  ;;  %v2642_v33 = vsel %vm622_vm1, %v2546_v38, %v2606_v20  ;;  %v2660_v39 = vcombine.low %v2637_v2, %v2638_v59  ;;  %v2860_v3 = vsel %vm2858_vm11, %v2859_v11, %v5526_v31  ;;  %v6957_v38 = vld [vmem:[#allocation11_spill] sm:$0xff] }
 0x14d   :  { %v2709_v15 = vcombine.low %v2701_v35, %v2708_v32  ;;  %v4904_v53 = vcombine.low %v2667_v34, %v2684_v12  ;;  %v2677_v16 = vcombine.low %v2641_v17, %v2642_v33  ;;  %v4906_v1 = vcombine.low %v2708_v32, %v2708_v32 }
 0x14e   :  { %vm2958_vm15 = vcmp.lt.s32.totalorder %v5734_v18, 2  ;;  %vm2959_vm0 = vcmp.eq.s32.totalorder %v5734_v18, 0  ;;  %v2674_v41 = vrot.slane %v2660_v39, %v5828_v37  ;;  %v2861_v36 = vsel %vm2854_vm9, %v6359_v51, %v2860_v3 }
 0x14f   :  { %v2719_v57 = vrot.slane %v4904_v53, %v5828_v37  ;;  %v2733_v47 = vrot.slane %v2709_v15, %v5828_v37  ;;  %v2691_v10 = vrot.slane %v2677_v16, %v5828_v37  ;;  %v2740_v61 = vrot.slane %v4906_v1, %v5828_v37 }
 0x150   :  { %v2960_v19 = vxor.u32 2147483648, %v5847_v52  ;;  %vm2962_vm3 = vcmp.eq.s32.totalorder %v5734_v18, 2  ;;  %v2862_v44 = vsel %vm2851_vm12, nan, %v2861_v36  ;;  %v2963_v45 = vxor.u32 2147483648, %v6957_v38 }
 0x151   :  { %v2741_v26 = vcombine.low %v2719_v57, %v2733_v47  ;;  %v2742_v62 = vcombine.high %v2719_v57, %v2733_v47  ;;  %v4905_v55 = vcombine.low %v2674_v41, %v2691_v10  ;;  %vm3061_vm4 = vcmp.lt.s32.totalorder %v6958_v25, 2 }
 0x152   :  { %v2961_v48 = vsel %vm2959_vm0, %v6957_v38, %v2960_v19  ;;  %vm3062_vm5 = vcmp.eq.s32.totalorder %v6958_v25, 0  ;;  %v2964_v58 = vsel %vm2962_vm3, %v2963_v45, %v5847_v52  ;;  %vm3065_vm6 = vcmp.eq.s32.totalorder %v6958_v25, 2 }
 0x153   :  { %v2745_v9 = vrot.slane %v2741_v26, 7  ;;  %v2746_v51 = vrot.slane %v2742_v62, 7  ;;  %v2726_v29 = vrot.slane %v4905_v55, %v5828_v37  ;;  %v3064_v30 = vsel %vm3062_vm5, %v5513_v63, %v2856_v54 }
 0x154   :  { %vm3164_vm7 = vcmp.lt.s32.totalorder %v6959_v14, 2  ;;  %vm3165_vm13 = vcmp.eq.s32.totalorder %v6959_v14, 0  ;;  %v2965_v54 = vsel %vm2958_vm15, %v2961_v48, %v2964_v58  ;;  %v3067_v42 = vsel %vm3065_vm6, %v2859_v11, %v5526_v31 }
 0x155   :  { %2753 = vst [vmem:[%s6915_s1 + $0x80] sm:$0x7e] %v2745_v9  ;;  %2754 = vst [vmem:[%s6915_s1 + $0x88] sm:$0x7e] %v2746_v51  ;;  %v2743_v0 = vcombine.low %v2726_v29, %v2740_v61  ;;  %v2744_v50 = vcombine.high %v2726_v29, %v2740_v61  ;;  %v2966_v5 = vsel %vm2955_vm14, nan, %v2965_v54  ;;  %v3068_v40 = vsel %vm3061_vm4, %v3064_v30, %v3067_v42 }
 0x156   :  { %v3167_v46 = vsel %vm3165_vm13, %v6957_v38, %v2960_v19  ;;  %vm3168_vm2 = vcmp.eq.s32.totalorder %v6959_v14, 2  ;;  %v3069_v18 = vsel %vm2851_vm12, nan, %v3068_v40  ;;  %v3181_v31 = vrot.slane %v2862_v44, %v5730_v60 }
 0x157   :  { %v2747_v49 = vrot.slane %v2743_v0, 7  ;;  %v2748_v8 = vrot.slane %v2744_v50, 7  ;;  %v3170_v23 = vsel %vm3168_vm2, %v2963_v45, %v5847_v52  ;;  %v3188_v11 = vrot.slane %v2966_v5, %v5730_v60 }
 0x158   :  { %v3171_v63 = vsel %vm3164_vm7, %v3167_v46, %v3170_v23  ;;  %v3214_v22 = vrot.slane %v3069_v18, %v5730_v60  ;;  %v3485_v52 = vmul.f32 %v3069_v18, %v2862_v44  ;;  %v3489_v28 = vmul.f32 %v3069_v18, %v3069_v18 }
 0x159   :  { %2755 = vst [vmem:[%s6915_s1 + $0x90] sm:$0x7e] %v2747_v49  ;;  %2756 = vst [vmem:[%s6915_s1 + $0x98] sm:$0x7e] %v2748_v8  ;;  %v3172_v4 = vsel %vm2955_vm14, nan, %v3171_v63  ;;  %v3491_v13 = vmul.f32 %v2862_v44, %v2862_v44  ;;  %v3189_v20 = vcombine.low %v3181_v31, %v3188_v11  ;;  %v3190_v34 = vcombine.high %v3181_v31, %v3188_v11 }
 0x15a   :  { %v3221_v12 = vrot.slane %v3172_v4, %v5730_v60  ;;  %v3486_v35 = vmul.f32 %v3172_v4, %v2966_v5  ;;  %v3490_v32 = vmul.f32 %v3172_v4, %v3172_v4  ;;  %v3492_v2 = vmul.f32 %v2966_v5, %v2966_v5 }
 0x15b   :  { %v6495_v59 = vmul.f32 2.0, %v3485_v52  ;;  %v6497_v17 = vsub.f32 %v3489_v28, %v3491_v13  ;;  %v3197_v33 = vrot.slane %v3189_v20, %v5730_v60  ;;  %v3204_v15 = vrot.slane %v3190_v34, %v5730_v60 }
 0x15c   :  { %v3222_v56 = vcombine.low %v3214_v22, %v3221_v12  ;;  %v3223_v53 = vcombine.high %v3214_v22, %v3221_v12  ;;  %v6501_v39 = vmul.f32 2.0, %v3486_v35  ;;  %v6503_v16 = vsub.f32 %v3490_v32, %v3492_v2 }
 0x15d   :  { %v6507_v1 = vrot.slane %v6495_v59, %v5730_v60  ;;  %v6511_v3 = vrot.slane %v6497_v17, %v5730_v60  ;;  %v3205_v57 = vcombine.high %v3197_v33, %v3197_v33  ;;  %v3242_v10 = vrot.slane %v3197_v33, %v5755_v6 }
 0x15e   :  { %v3230_v47 = vrot.slane %v3222_v56, %v5730_v60  ;;  %v3237_v41 = vrot.slane %v3223_v53, %v5730_v60  ;;  %v3246_v61 = vrot.slane %v3197_v33, %v5758_v7  ;;  %v3258_v36 = vrot.slane %v3204_v15, %v5755_v6 }
 0x15f   :  { %v3262_v19 = vrot.slane %v3204_v15, %v5758_v7  ;;  %v3250_v26 = vrot.slane %v3197_v33, %v5767_v21  ;;  %v3274_v55 = vrot.slane %v3205_v57, %v5755_v6  ;;  %v3278_v44 = vrot.slane %v3205_v57, %v5758_v7 }
 0x160   :  { %v3238_v62 = vcombine.high %v3230_v47, %v3230_v47  ;;  %v3282_v38 = vrot.slane %v3205_v57, %v5767_v21  ;;  %v3286_v48 = vrot.slane %v3205_v57, %v5770_v27  ;;  %v3302_v45 = vrot.slane %v3230_v47, %v5755_v6 }
 0x161   :  { %v3306_v25 = vrot.slane %v3230_v47, %v5758_v7  ;;  %v3318_v9 = vrot.slane %v3237_v41, %v5755_v6  ;;  %v3322_v51 = vrot.slane %v3237_v41, %v5758_v7  ;;  %v3254_v31 = vrot.slane %v3197_v33, %v5770_v27 }
 0x162   :  { %v3334_v29 = vrot.slane %v3238_v62, %v5755_v6  ;;  %v3338_v30 = vrot.slane %v3238_v62, %v5758_v7  ;;  %v3342_v58 = vrot.slane %v3238_v62, %v5767_v21  ;;  %v3346_v14 = vrot.slane %v3238_v62, %v5770_v27 }
 0x163   :  { %v3359_v0 = vsel %vm622_vm1, %v3242_v10, %v3302_v45  ;;  %v3360_v50 = vsel %vm622_vm1, %v3246_v61, %v3306_v25  ;;  %v3363_v54 = vsel %vm622_vm1, %v3258_v36, %v3318_v9  ;;  %v3364_v42 = vsel %vm622_vm1, %v3262_v19, %v3322_v51 }
 0x164   :  { %v3367_v5 = vsel %vm622_vm1, %v3274_v55, %v3334_v29  ;;  %v3368_v40 = vsel %vm622_vm1, %v3278_v44, %v3338_v30  ;;  %v3369_v46 = vsel %vm622_vm1, %v3282_v38, %v3342_v58  ;;  %v3370_v49 = vsel %vm622_vm1, %v3286_v48, %v3346_v14 }
 0x165   :  { %v3383_v8 = vcombine.low %v3359_v0, %v3360_v50  ;;  %v3400_v18 = vcombine.low %v3363_v54, %v3364_v42  ;;  %v3417_v23 = vcombine.low %v3367_v5, %v3368_v40  ;;  %v3418_v63 = vcombine.low %v3369_v46, %v3370_v49 }
 0x166   :  { %v3266_v11 = vrot.slane %v3204_v15, %v5767_v21  ;;  %v3270_v22 = vrot.slane %v3204_v15, %v5770_v27  ;;  %v3310_v13 = vrot.slane %v3230_v47, %v5767_v21  ;;  %v3314_v34 = vrot.slane %v3230_v47, %v5770_v27 }
 0x167   :  { %v3391_v4 = vrot.slane %v3383_v8, %v5828_v37  ;;  %v3408_v52 = vrot.slane %v3400_v18, %v5828_v37  ;;  %v3425_v28 = vrot.slane %v3417_v23, %v5828_v37  ;;  %v3432_v20 = vrot.slane %v3418_v63, %v5828_v37 }
 0x168   :  { %v3326_v12 = vrot.slane %v3237_v41, %v5767_v21  ;;  %v3330_v35 = vrot.slane %v3237_v41, %v5770_v27  ;;  %v3361_v2 = vsel %vm622_vm1, %v3250_v26, %v3310_v13  ;;  %v3510_v33 = vrot.slane %v6501_v39, %v5730_v60 }
 0x169   :  { %v4923_v32 = vcombine.low %v3391_v4, %v3408_v52  ;;  %v3543_v15 = vrot.slane %v6503_v16, %v5730_v60  ;;  %v3433_v56 = vcombine.low %v3425_v28, %v3432_v20  ;;  %v3362_v53 = vsel %vm622_vm1, %v3254_v31, %v3314_v34 }
 0x16a   :  { %v3365_v57 = vsel %vm622_vm1, %v3266_v11, %v3326_v12  ;;  %v3366_v47 = vsel %vm622_vm1, %v3270_v22, %v3330_v35  ;;  %v3384_v61 = vcombine.low %v3361_v2, %v3362_v53  ;;  %v4925_v36 = vcombine.low %v3432_v20, %v3432_v20 }
 0x16b   :  { %v3443_v10 = vrot.slane %v4923_v32, %v5828_v37  ;;  %v3401_v41 = vcombine.low %v3365_v57, %v3366_v47  ;;  %v3457_v19 = vrot.slane %v3433_v56, %v5828_v37  ;;  %v3511_v26 = vcombine.low %v6507_v1, %v3510_v33 }
 0x16c   :  { %v3512_v62 = vcombine.high %v6507_v1, %v3510_v33  ;;  %v3544_v55 = vcombine.low %v6511_v3, %v3543_v15  ;;  %v3398_v44 = vrot.slane %v3384_v61, %v5828_v37  ;;  %v3464_v48 = vrot.slane %v4925_v36, %v5828_v37 }
 0x16d   :  { %v3415_v38 = vrot.slane %v3401_v41, %v5828_v37  ;;  %v3545_v45 = vcombine.high %v6511_v3, %v3543_v15  ;;  %v3465_v25 = vcombine.low %v3443_v10, %v3457_v19  ;;  %v3466_v9 = vcombine.high %v3443_v10, %v3457_v19 }
 0x16e   :  { %v6569_v51 = vrot.slane %v3511_v26, %v5730_v60  ;;  %v6572_v29 = vrot.slane %v3512_v62, %v5730_v60  ;;  %v6575_v1 = vrot.slane %v3544_v55, %v5730_v60  ;;  %v3807_v14 = vmul.f32 %v6497_v17, %v6495_v59 }
 0x16f   :  { %v4924_v30 = vcombine.low %v3398_v44, %v3415_v38  ;;  %v6578_v58 = vrot.slane %v3545_v45, %v5730_v60  ;;  %v3469_v0 = vrot.slane %v3465_v25, 1  ;;  %v3470_v3 = vrot.slane %v3466_v9, 1 }
 0x170   :  { %v3527_v50 = vcombine.high %v6569_v51, %v6569_v51  ;;  %v3564_v54 = vrot.slane %v6569_v51, %v5755_v6  ;;  %v3560_v5 = vcombine.high %v6575_v1, %v6575_v1  ;;  %v3568_v40 = vrot.slane %v6569_v51, %v5758_v7 }
 0x171   :  { %v3450_v42 = vrot.slane %v4924_v30, %v5828_v37  ;;  %v3580_v46 = vrot.slane %v6572_v29, %v5755_v6  ;;  %3477 = vst [vmem:[%s6915_s1 + $0x80] sm:$0x80] %v3469_v0  ;;  %3481 = vst [vmem:[%s6915_s1 + $0xa0] sm:$0x1f] %v3469_v0  ;;  %v3584_v49 = vrot.slane %v6572_v29, %v5758_v7  ;;  %vm4327_vm12 = vweird.f32 %v5524_v24 }
 0x172   :  { %3478 = vst [vmem:[%s6915_s1 + $0x88] sm:$0x80] %v3470_v3  ;;  %3482 = vst [vmem:[%s6915_s1 + $0xa8] sm:$0x1f] %v3470_v3  ;;  %v3596_v8 = vrot.slane %v3527_v50, %v5755_v6  ;;  %v3600_v18 = vrot.slane %v3527_v50, %v5758_v7  ;;  %v3604_v23 = vrot.slane %v3527_v50, %v5767_v21 }
 0x173   :  { %v3467_v63 = vcombine.low %v3450_v42, %v3464_v48  ;;  %v3468_v31 = vcombine.high %v3450_v42, %v3464_v48  ;;  %v3608_v11 = vrot.slane %v3527_v50, %v5770_v27  ;;  %v3624_v22 = vrot.slane %v6575_v1, %v5755_v6 }
 0x174   :  { %v3628_v4 = vrot.slane %v6575_v1, %v5758_v7  ;;  %v3640_v52 = vrot.slane %v6578_v58, %v5755_v6  ;;  %v3644_v28 = vrot.slane %v6578_v58, %v5758_v7  ;;  %v3656_v13 = vrot.slane %v3560_v5, %v5755_v6 }
 0x175   :  { %v3471_v20 = vrot.slane %v3467_v63, 1  ;;  %v3472_v34 = vrot.slane %v3468_v31, 1  ;;  %v3660_v12 = vrot.slane %v3560_v5, %v5758_v7  ;;  %v3664_v35 = vrot.slane %v3560_v5, %v5767_v21 }
 0x176   :  { %v3668_v32 = vrot.slane %v3560_v5, %v5770_v27  ;;  %v3681_v2 = vsel %vm622_vm1, %v3564_v54, %v3624_v22  ;;  %v3682_v33 = vsel %vm622_vm1, %v3568_v40, %v3628_v4  ;;  %v3685_v15 = vsel %vm622_vm1, %v3580_v46, %v3640_v52 }
 0x177   :  { %3479 = vst [vmem:[%s6915_s1 + $0x90] sm:$0x80] %v3471_v20  ;;  %3483 = vst [vmem:[%s6915_s1 + $0xb0] sm:$0x1f] %v3471_v20  ;;  %v3686_v56 = vsel %vm622_vm1, %v3584_v49, %v3644_v28  ;;  %v3689_v53 = vsel %vm622_vm1, %v3596_v8, %v3656_v13  ;;  %v3690_v57 = vsel %vm622_vm1, %v3600_v18, %v3660_v12  ;;  %v3809_v54 = vmul.f32 2.0, %v3807_v14 }
 0x178   :  { %3480 = vst [vmem:[%s6915_s1 + $0x98] sm:$0x80] %v3472_v34  ;;  %3484 = vst [vmem:[%s6915_s1 + $0xb8] sm:$0x1f] %v3472_v34  ;;  %v3691_v47 = vsel %vm622_vm1, %v3604_v23, %v3664_v35  ;;  %v3692_v10 = vsel %vm622_vm1, %v3608_v11, %v3668_v32  ;;  %v3705_v61 = vcombine.low %v3681_v2, %v3682_v33 }
 0x179   :  { %v3722_v41 = vcombine.low %v3685_v15, %v3686_v56  ;;  %v3739_v36 = vcombine.low %v3689_v53, %v3690_v57  ;;  %v3740_v19 = vcombine.low %v3691_v47, %v3692_v10  ;;  %v3572_v26 = vrot.slane %v6569_v51, %v5767_v21  ;;  %v6961_v56 = vld [vmem:[#allocation10_spill] sm:$0xff] }
 0x17a   :  { %v3576_v62 = vrot.slane %v6569_v51, %v5770_v27  ;;  %v3588_v55 = vrot.slane %v6572_v29, %v5767_v21  ;;  %v3713_v44 = vrot.slane %v3705_v61, %v5828_v37  ;;  %v3592_v45 = vrot.slane %v6572_v29, %v5770_v27  ;;  %v6962_v61 = vld [vmem:[#allocation7_spill] sm:$0xff] }
 0x17b   :  { %v3730_v38 = vrot.slane %v3722_v41, %v5828_v37  ;;  %v3747_v48 = vrot.slane %v3739_v36, %v5828_v37  ;;  %v3754_v25 = vrot.slane %v3740_v19, %v5828_v37  ;;  %v3632_v9 = vrot.slane %v6575_v1, %v5767_v21  ;;  %v6963_v36 = vld [vmem:[#allocation6_spill] sm:$0xff] }
 0x17c   :  { %v3636_v51 = vrot.slane %v6575_v1, %v5770_v27  ;;  %v3648_v30 = vrot.slane %v6578_v58, %v5767_v21  ;;  %v3652_v3 = vrot.slane %v6578_v58, %v5770_v27  ;;  %v3808_v50 = vmul.f32 %v6503_v16, %v6501_v39 }
 0x17d   :  { %v4926_v0 = vcombine.low %v3713_v44, %v3730_v38  ;;  %v3755_v29 = vcombine.low %v3747_v48, %v3754_v25  ;;  %v3683_v42 = vsel %vm622_vm1, %v3572_v26, %v3632_v9  ;;  %v4928_v8 = vcombine.low %v3754_v25, %v3754_v25 }
 0x17e   :  { %v3684_v5 = vsel %vm622_vm1, %v3576_v62, %v3636_v51  ;;  %v3687_v40 = vsel %vm622_vm1, %v3588_v55, %v3648_v30  ;;  %v3688_v46 = vsel %vm622_vm1, %v3592_v45, %v3652_v3  ;;  %v3810_v23 = vmul.f32 2.0, %v3808_v50 }
 0x17f   :  { %v3765_v1 = vrot.slane %v4926_v0, %v5828_v37  ;;  %v3706_v49 = vcombine.low %v3683_v42, %v3684_v5  ;;  %v3779_v18 = vrot.slane %v3755_v29, %v5828_v37  ;;  %v3723_v58 = vcombine.low %v3687_v40, %v3688_v46  ;;  %v6964_v42 = vld [vmem:[#allocation5_spill] sm:$0xff] }
 0x180   :  { %v3811_v14 = vmul.f32 %v6497_v17, %v6497_v17  ;;  %v4323_v31 = vsel %vm5716_vm10, %v5524_v24, %v6331_v43  ;;  %v3812_v22 = vmul.f32 %v6503_v16, %v6503_v16  ;;  %v3813_v4 = vmul.f32 %v6495_v59, %v6495_v59 }
 0x181   :  { %v3720_v11 = vrot.slane %v3706_v49, %v5828_v37  ;;  %v3787_v52 = vcombine.low %v3765_v1, %v3779_v18  ;;  %v3788_v28 = vcombine.high %v3765_v1, %v3779_v18  ;;  %v3737_v13 = vrot.slane %v3723_v58, %v5828_v37 }
 0x182   :  { %v3814_v17 = vmul.f32 %v6501_v39, %v6501_v39  ;;  %v3786_v20 = vrot.slane %v4928_v8, %v5828_v37  ;;  %v3815_v34 = vsub.f32 %v3811_v14, %v3813_v4  ;;  %v3825_v43 = vrot.slane %v3809_v54, %v5730_v60 }
 0x183   :  { %v3832_v12 = vrot.slane %v3810_v23, %v5730_v60  ;;  %v3791_v35 = vrot.slane %v3787_v52, 3  ;;  %v3792_v32 = vrot.slane %v3788_v28, 3  ;;  %v4927_v16 = vcombine.low %v3720_v11, %v3737_v13  ;;  %v6965_v11 = vld [vmem:[#allocation2_spill] sm:$0xff] }
 0x184   :  { %v3816_v2 = vsub.f32 %v3812_v22, %v3814_v17  ;;  %5021 = vcosq.f32 %v4323_v31  ;;  %v3858_v15 = vrot.slane %v3815_v34, %v5730_v60  ;;  %v6690_v53 = vand.u32 3, %v6961_v56 }
 0x185   :  { %v3833_v59 = vcombine.low %v3825_v43, %v3832_v12  ;;  %v3834_v33 = vcombine.high %v3825_v43, %v3832_v12  ;;  %5023 = vsinq.f32 %v4323_v31  ;;  %3799 = vst [vmem:[%s6915_s1 + $0xc0] ss:$-28 sps:$4 sm:$0xe7] %v3791_v35   ;;  %3800 = vst [vmem:[%s6915_s1 + $0xc8] ss:$-28 sps:$4 sm:$0xe7] %v3792_v32   ;;  %v3772_v39 = vrot.slane %v4927_v16, %v5828_v37 }
 0x186   :  { %v3865_v57 = vrot.slane %v3816_v2, %v5730_v60  ;;  %v4228_v41 = vxor.u32 2147483648, %v6962_v61  ;;  %v4231_v19 = vxor.u32 2147483648, %v6963_v36  ;;  %vm4227_vm10 = vcmp.eq.s32.totalorder %v6964_v42, 0 }
 0x187   :  { %v6701_v47 = vrot.slane %v3833_v59, %v5730_v60  ;;  %v6704_v10 = vrot.slane %v3834_v33, %v5730_v60  ;;  %v3789_v26 = vcombine.low %v3772_v39, %v3786_v20  ;;  %v3790_v62 = vcombine.high %v3772_v39, %v3786_v20 }
 0x188   :  { %v3866_v55 = vcombine.low %v3858_v15, %v3865_v57  ;;  %v3867_v44 = vcombine.high %v3858_v15, %v3865_v57  ;;  %vm4230_vm8 = vcmp.eq.s32.totalorder %v6964_v42, 2  ;;  %vm4226_vm11 = vcmp.lt.s32.totalorder %v6964_v42, 2 }
 0x189   :  { %v3849_v38 = vcombine.high %v6701_v47, %v6701_v47  ;;  %v3886_v48 = vrot.slane %v6701_v47, %v5755_v6  ;;  %v3890_v45 = vrot.slane %v6701_v47, %v5758_v7  ;;  %v3902_v25 = vrot.slane %v6704_v10, %v5755_v6 }
 0x18a   :  { %v3793_v9 = vrot.slane %v3789_v26, 3  ;;  %v3794_v51 = vrot.slane %v3790_v62, 3  ;;  %v3874_v30 = vrot.slane %v3866_v55, %v5730_v60  ;;  %v3881_v0 = vrot.slane %v3867_v44, %v5730_v60 }
 0x18b   :  { %v3906_v3 = vrot.slane %v6704_v10, %v5758_v7  ;;  %v3918_v50 = vrot.slane %v3849_v38, %v5755_v6  ;;  %v3922_v54 = vrot.slane %v3849_v38, %v5758_v7  ;;  %v3926_v29 = vrot.slane %v3849_v38, %v5767_v21 }
 0x18c   :  { %3801 = vst [vmem:[%s6915_s1 + $0xd0] ss:$-28 sps:$4 sm:$0xe7] %v3793_v9   ;;  %3802 = vst [vmem:[%s6915_s1 + $0xd8] ss:$-28 sps:$4 sm:$0xe7] %v3794_v51   ;;  %v3882_v5 = vcombine.high %v3874_v30, %v3874_v30  ;;  %v3930_v40 = vrot.slane %v3849_v38, %v5770_v27  ;;  %v3946_v1 = vrot.slane %v3874_v30, %v5755_v6  ;;  %vm4223_vm9 = vweird.f32 %v6965_v11 }
 0x18d   :  { %v3950_v46 = vrot.slane %v3874_v30, %v5758_v7  ;;  %v3962_v49 = vrot.slane %v3881_v0, %v5755_v6  ;;  %v3966_v8 = vrot.slane %v3881_v0, %v5758_v7  ;;  %v3894_v18 = vrot.slane %v6701_v47, %v5767_v21 }
 0x18e   :  { %v3898_v58 = vrot.slane %v6701_v47, %v5770_v27  ;;  %v3978_v23 = vrot.slane %v3882_v5, %v5755_v6  ;;  %v3982_v14 = vrot.slane %v3882_v5, %v5758_v7  ;;  %v3986_v63 = vrot.slane %v3882_v5, %v5767_v21 }
 0x18f   :  { %v3990_v31 = vrot.slane %v3882_v5, %v5770_v27  ;;  %v4003_v22 = vsel %vm622_vm1, %v3886_v48, %v3946_v1  ;;  %v4004_v4 = vsel %vm622_vm1, %v3890_v45, %v3950_v46  ;;  %v4007_v52 = vsel %vm622_vm1, %v3902_v25, %v3962_v49 }
 0x190   :  { %v4008_v28 = vsel %vm622_vm1, %v3906_v3, %v3966_v8  ;;  %v4011_v13 = vsel %vm622_vm1, %v3918_v50, %v3978_v23  ;;  %v4012_v17 = vsel %vm622_vm1, %v3922_v54, %v3982_v14  ;;  %v4013_v20 = vsel %vm622_vm1, %v3926_v29, %v3986_v63  ;;  %v6966_v63 = vld [vmem:[#allocation4_spill] sm:$0xff] }
 0x191   :  { %v4014_v34 = vsel %vm622_vm1, %v3930_v40, %v3990_v31  ;;  %v4027_v43 = vcombine.low %v4003_v22, %v4004_v4  ;;  %v4044_v12 = vcombine.low %v4007_v52, %v4008_v28  ;;  %v4061_v35 = vcombine.low %v4011_v13, %v4012_v17  ;;  %v6754_v16 = vpop.eup %5021 }
 0x192   :  { %v4062_v32 = vcombine.low %v4013_v20, %v4014_v34  ;;  %v3910_v2 = vrot.slane %v6704_v10, %v5767_v21  ;;  %v3914_v59 = vrot.slane %v6704_v10, %v5770_v27  ;;  %v3954_v33 = vrot.slane %v3874_v30, %v5767_v21  ;;  %v6762_v56 = vpop.eup %5023  ;;  %v6967_v34 = vld [vmem:[#allocation12_spill] sm:$0xff] }
 0x193   :  { %v3958_v15 = vrot.slane %v3874_v30, %v5770_v27  ;;  %v4035_v39 = vrot.slane %v4027_v43, %v5828_v37  ;;  %v4052_v57 = vrot.slane %v4044_v12, %v5828_v37  ;;  %v4069_v47 = vrot.slane %v4061_v35, %v5828_v37 }
 0x194   :  { %v4076_v26 = vrot.slane %v4062_v32, %v5828_v37  ;;  %v3970_v62 = vrot.slane %v3881_v0, %v5767_v21  ;;  %v3974_v55 = vrot.slane %v3881_v0, %v5770_v27  ;;  %v4005_v10 = vsel %vm622_vm1, %v3894_v18, %v3954_v33 }
 0x195   :  { %v4006_v44 = vsel %vm622_vm1, %v3898_v58, %v3958_v15  ;;  %v4929_v48 = vcombine.low %v4035_v39, %v4052_v57  ;;  %v4229_v30 = vsel %vm4227_vm10, %v6963_v36, %v4228_v41  ;;  %v4232_v0 = vsel %vm4230_vm8, %v4231_v19, %v6962_v61 }
 0x196   :  { %v4077_v38 = vcombine.low %v4069_v47, %v4076_v26  ;;  %v4028_v45 = vcombine.low %v4005_v10, %v4006_v44  ;;  %v4931_v25 = vcombine.low %v4076_v26, %v4076_v26  ;;  %v4009_v9 = vsel %vm622_vm1, %v3910_v2, %v3970_v62 }
 0x197   :  { %v4010_v51 = vsel %vm622_vm1, %v3914_v59, %v3974_v55  ;;  %v4087_v3 = vrot.slane %v4929_v48, %v5828_v37  ;;  %v4233_v40 = vsel %vm4226_vm11, %v4229_v30, %v4232_v0  ;;  %vm4330_vm14 = vcmp.lt.s32.totalorder %v6690_v53, 2 }
 0x198   :  { %v4101_v50 = vrot.slane %v4077_v38, %v5828_v37  ;;  %v4042_v54 = vrot.slane %v4028_v45, %v5828_v37  ;;  %v4045_v29 = vcombine.low %v4009_v9, %v4010_v51  ;;  %v4108_v5 = vrot.slane %v4931_v25, %v5828_v37 }
 0x199   :  { %v4234_v8 = vsel %vm4223_vm9, nan, %v4233_v40  ;;  %vm4331_vm15 = vcmp.eq.s32.totalorder %v6690_v53, 0  ;;  %v4332_v18 = vxor.u32 2147483648, %v6762_v56  ;;  %vm4334_vm0 = vcmp.eq.s32.totalorder %v6690_v53, 2 }
 0x19a   :  { %v4109_v1 = vcombine.low %v4087_v3, %v4101_v50  ;;  %v4110_v46 = vcombine.high %v4087_v3, %v4101_v50  ;;  %v4059_v49 = vrot.slane %v4045_v29, %v5828_v37  ;;  %v4335_v42 = vxor.u32 2147483648, %v6754_v16 }
 0x19b   :  { %vm4433_vm3 = vcmp.lt.s32.totalorder %v6966_v63, 2  ;;  %v4333_v31 = vsel %vm4331_vm15, %v6754_v16, %v4332_v18  ;;  %vm4434_vm4 = vcmp.eq.s32.totalorder %v6966_v63, 0  ;;  %vm4437_vm5 = vcmp.eq.s32.totalorder %v6966_v63, 2 }
 0x19c   :  { %v4113_v58 = vrot.slane %v4109_v1, 5  ;;  %v4114_v23 = vrot.slane %v4110_v46, 5  ;;  %v4930_v14 = vcombine.low %v4042_v54, %v4059_v49  ;;  %v4336_v22 = vsel %vm4334_vm0, %v4335_v42, %v6762_v56 }
 0x19d   :  { %v4337_v52 = vsel %vm4330_vm14, %v4333_v31, %v4336_v22  ;;  %v4436_v28 = vsel %vm4434_vm4, %v6963_v36, %v4228_v41  ;;  %v4439_v13 = vsel %vm4437_vm5, %v4231_v19, %v6962_v61  ;;  %vm4536_vm6 = vcmp.lt.s32.totalorder %v6967_v34, 2 }
 0x19e   :  { %4121 = vst [vmem:[%s6915_s1 + $0xc0] sm:$0xf8] %v4113_v58  ;;  %4125 = vst [vmem:[%s6915_s1 + $0xe0] sm:$0x1] %v4113_v58  ;;  %v4094_v4 = vrot.slane %v4930_v14, %v5828_v37  ;;  %v4338_v17 = vsel %vm4327_vm12, nan, %v4337_v52  ;;  %v4440_v20 = vsel %vm4433_vm3, %v4436_v28, %v4439_v13  ;;  %vm4537_vm7 = vcmp.eq.s32.totalorder %v6967_v34, 0 }
 0x19f   :  { %4122 = vst [vmem:[%s6915_s1 + $0xc8] sm:$0xf8] %v4114_v23  ;;  %4126 = vst [vmem:[%s6915_s1 + $0xe8] sm:$0x1] %v4114_v23  ;;  %v4441_v53 = vsel %vm4223_vm9, nan, %v4440_v20  ;;  %v4539_v35 = vsel %vm4537_vm7, %v6754_v16, %v4332_v18  ;;  %vm4540_vm13 = vcmp.eq.s32.totalorder %v6967_v34, 2  ;;  %v4553_v41 = vrot.slane %v4234_v8, %v5730_v60 }
 0x1a0   :  { %v4111_v43 = vcombine.low %v4094_v4, %v4108_v5  ;;  %v4112_v12 = vcombine.high %v4094_v4, %v4108_v5  ;;  %v4560_v61 = vrot.slane %v4338_v17, %v5730_v60  ;;  %v4542_v32 = vsel %vm4540_vm13, %v4335_v42, %v6762_v56 }
 0x1a1   :  { %v4543_v2 = vsel %vm4536_vm6, %v4539_v35, %v4542_v32  ;;  %v4586_v15 = vrot.slane %v4441_v53, %v5730_v60 }
 0x1a2   :  { %v4115_v36 = vrot.slane %v4111_v43, 5  ;;  %v4116_v19 = vrot.slane %v4112_v12, 5  ;;  %v4561_v59 = vcombine.low %v4553_v41, %v4560_v61  ;;  %v4562_v33 = vcombine.high %v4553_v41, %v4560_v61 }
 0x1a3   :  { %v4544_v11 = vsel %vm4327_vm12, nan, %v4543_v2 }
 0x1a4   :  { %4123 = vst [vmem:[%s6915_s1 + $0xd0] sm:$0xf8] %v4115_v36  ;;  %4127 = vst [vmem:[%s6915_s1 + $0xf0] sm:$0x1] %v4115_v36  ;;  %v4569_v16 = vrot.slane %v4561_v59, %v5730_v60  ;;  %v4576_v56 = vrot.slane %v4562_v33, %v5730_v60  ;;  %v4593_v39 = vrot.slane %v4544_v11, %v5730_v60 }
 0x1a5   :  { %4124 = vst [vmem:[%s6915_s1 + $0xd8] sm:$0xf8] %v4116_v19  ;;  %4128 = vst [vmem:[%s6915_s1 + $0xf8] sm:$0x1] %v4116_v19 }
 0x1a6   :  { %v4577_v57 = vcombine.high %v4569_v16, %v4569_v16  ;;  %v4594_v47 = vcombine.low %v4586_v15, %v4593_v39  ;;  %v4595_v26 = vcombine.high %v4586_v15, %v4593_v39  ;;  %v4614_v62 = vrot.slane %v4569_v16, %v5755_v6 }
 0x1a7   :  { %v4618_v55 = vrot.slane %v4569_v16, %v5758_v7  ;;  %v4630_v10 = vrot.slane %v4576_v56, %v5755_v6  ;;  %v4634_v44 = vrot.slane %v4576_v56, %v5758_v7  ;;  %v4622_v24 = vrot.slane %v4569_v16, %v5767_v21 }
 0x1a8   :  { %v4602_v38 = vrot.slane %v4594_v47, %v5730_v60  ;;  %v4609_v48 = vrot.slane %v4595_v26, %v5730_v60  ;;  %v4646_v45 = vrot.slane %v4577_v57, %v5755_v6  ;;  %v4650_v25 = vrot.slane %v4577_v57, %v5758_v7 }
 0x1a9   :  { %v4654_v9 = vrot.slane %v4577_v57, %v5767_v21  ;;  %v4658_v51 = vrot.slane %v4577_v57, %v5770_v27  ;;  %v4626_v30 = vrot.slane %v4569_v16, %v5770_v27  ;;  %v4638_v0 = vrot.slane %v4576_v56, %v5767_v21 }
 0x1aa   :  { %v4610_v3 = vcombine.high %v4602_v38, %v4602_v38  ;;  %v4674_v50 = vrot.slane %v4602_v38, %v5755_v6  ;;  %v4678_v54 = vrot.slane %v4602_v38, %v5758_v7  ;;  %v4690_v29 = vrot.slane %v4609_v48, %v5755_v6 }
 0x1ab   :  { %v4694_v60 = vrot.slane %v4609_v48, %v5758_v7  ;;  %v4642_v5 = vrot.slane %v4576_v56, %v5770_v27  ;;  %v4682_v40 = vrot.slane %v4602_v38, %v5767_v21  ;;  %v4686_v1 = vrot.slane %v4602_v38, %v5770_v27 }
 0x1ac   :  { %v4706_v46 = vrot.slane %v4610_v3, %v5755_v6  ;;  %v4710_v49 = vrot.slane %v4610_v3, %v5758_v7  ;;  %v4714_v8 = vrot.slane %v4610_v3, %v5767_v21  ;;  %v4718_v18 = vrot.slane %v4610_v3, %v5770_v27 }
 0x1ad   :  { %v4731_v42 = vsel %vm622_vm1, %v4614_v62, %v4674_v50  ;;  %v4732_v58 = vsel %vm622_vm1, %v4618_v55, %v4678_v54  ;;  %v4735_v23 = vsel %vm622_vm1, %v4630_v10, %v4690_v29  ;;  %v4736_v14 = vsel %vm622_vm1, %v4634_v44, %v4694_v60 }
 0x1ae   :  { %v4739_v63 = vsel %vm622_vm1, %v4646_v45, %v4706_v46  ;;  %v4740_v31 = vsel %vm622_vm1, %v4650_v25, %v4710_v49  ;;  %v4741_v6 = vsel %vm622_vm1, %v4654_v9, %v4714_v8  ;;  %v4742_v7 = vsel %vm622_vm1, %v4658_v51, %v4718_v18 }
 0x1af   :  { %v4755_v22 = vcombine.low %v4731_v42, %v4732_v58  ;;  %v4772_v4 = vcombine.low %v4735_v23, %v4736_v14  ;;  %v4789_v52 = vcombine.low %v4739_v63, %v4740_v31  ;;  %v4790_v28 = vcombine.low %v4741_v6, %v4742_v7 }
 0x1b0   :  { %v4698_v13 = vrot.slane %v4609_v48, %v5767_v21  ;;  %v4702_v17 = vrot.slane %v4609_v48, %v5770_v27  ;;  %v4733_v20 = vsel %vm622_vm1, %v4622_v24, %v4682_v40  ;;  %v4734_v34 = vsel %vm622_vm1, %v4626_v30, %v4686_v1 }
 0x1b1   :  { %v4763_v43 = vrot.slane %v4755_v22, %v5828_v37  ;;  %v4780_v12 = vrot.slane %v4772_v4, %v5828_v37  ;;  %v4797_v53 = vrot.slane %v4789_v52, %v5828_v37  ;;  %v4804_v35 = vrot.slane %v4790_v28, %v5828_v37 }
 0x1b2   :  { %v4737_v41 = vsel %vm622_vm1, %v4638_v0, %v4698_v13  ;;  %v4738_v61 = vsel %vm622_vm1, %v4642_v5, %v4702_v17  ;;  %v4756_v36 = vcombine.low %v4733_v20, %v4734_v34 }
 0x1b3   :  { %v4805_v21 = vcombine.low %v4797_v53, %v4804_v35  ;;  %v4948_v19 = vcombine.low %v4763_v43, %v4780_v12  ;;  %v4773_v27 = vcombine.low %v4737_v41, %v4738_v61  ;;  %v4950_v32 = vcombine.low %v4804_v35, %v4804_v35 }
 0x1b4   :  { %v4770_v2 = vrot.slane %v4756_v36, %v5828_v37 }
 0x1b5   :  { %v4815_v59 = vrot.slane %v4948_v19, %v5828_v37  ;;  %v4829_v33 = vrot.slane %v4805_v21, %v5828_v37  ;;  %v4787_v15 = vrot.slane %v4773_v27, %v5828_v37  ;;  %v4836_v39 = vrot.slane %v4950_v32, %v5828_v37 }
 0x1b7   :  { %v4837_v11 = vcombine.low %v4815_v59, %v4829_v33  ;;  %v4838_v16 = vcombine.high %v4815_v59, %v4829_v33  ;;  %v4949_v56 = vcombine.low %v4770_v2, %v4787_v15 }
 0x1b9   :  { %v4841_v57 = vrot.slane %v4837_v11, 7  ;;  %v4842_v47 = vrot.slane %v4838_v16, 7  ;;  %v4822_v26 = vrot.slane %v4949_v56, %v5828_v37 }
 0x1bb   :  { %4849 = vst [vmem:[%s6915_s1 + $0xe0] sm:$0x7e] %v4841_v57  ;;  %4850 = vst [vmem:[%s6915_s1 + $0xe8] sm:$0x7e] %v4842_v47  ;;  %v4839_v62 = vcombine.low %v4822_v26, %v4836_v39  ;;  %v4840_v55 = vcombine.high %v4822_v26, %v4836_v39 }
 0x1bd   :  { %v4843_v10 = vrot.slane %v4839_v62, 7  ;;  %v4844_v44 = vrot.slane %v4840_v55, 7 }
 0x1bf   :  { %4851 = vst [vmem:[%s6915_s1 + $0xf0] sm:$0x7e] %v4843_v10  ;;  %4852 = vst [vmem:[%s6915_s1 + $0xf8] sm:$0x7e] %v4844_v44 }

</bundles_post_ra>
